<compile_context>
chip_gen: v5e
topology: v5e:2x2
jax: 0.10.0
libtpu: 0.0.40
codegen_flags: <defaults>
</compile_context>

<pallas_src>
import numpy as np

import jax
import jax.numpy as jnp
from jax.experimental import pallas as pl
from jax.experimental.pallas import tpu as pltpu


def _cdiv(a, b):
    return (a + b - 1) // b


def _round_up(a, b):
    return _cdiv(a, b) * b


def _make_conv_kernel(wp, tile_lanes, win, k, tph, act, fuse_taps, c1p):
    """Per-(batch, split, tile) kernel body.

    Layout: channels on sublanes, flattened padded spatial (tile_lanes lanes,
    a multiple of 128) on lanes.  Tap (ky, kx) of output lane q lives at input
    lane q + ky*wp + kx in the same flat layout (rows pre-padded by r each side),
    so every tap is a pure static lane offset -- no boundary masks.
    """
    offsets = [ky * wp + kx for ky in range(k) for kx in range(k)]

    def kernel(x_hbm, w_ref, b_ref, out_ref, xbuf, sem):
        b = pl.program_id(0)
        sp = pl.program_id(1)
        t = pl.program_id(2)
        tile = sp * tph + t

        def start_fetch(tile_idx, sl):
            start = pl.multiple_of(tile_idx * tile_lanes, 128)
            pltpu.make_async_copy(
                x_hbm.at[b, :, pl.ds(start, win)],
                xbuf.at[sl],
                sem.at[sl],
            ).start()

        # Prime the pipeline at the first tile of every (batch, split).  The
        # prefetch chain is confined to the "arbitrary" tile axis so both the
        # batch and split axes can safely be megacore-parallel.
        @pl.when(t == 0)
        def _():
            start_fetch(tile, 0)

        slot = t % 2

        # Prefetch the next tile's halo window into the other buffer.
        @pl.when(t + 1 < tph)
        def _():
            start_fetch(tile + 1, 1 - slot)

        # Wait for the current tile's haloed window (only shapes matter here).
        pltpu.make_async_copy(
            x_hbm.at[0, :, pl.ds(0, win)], xbuf.at[slot], sem.at[slot]
        ).wait()

        if fuse_taps:
            # Small-c1 path: one fused GEMM with K = k*k*c1p.  Taps are read
            # directly from the VMEM ref (no full-window value load).
            slab = jnp.concatenate(
                [xbuf[slot, :, off:off + tile_lanes] for off in offsets], axis=0)
            y = jnp.dot(w_ref[...], slab, preferred_element_type=jnp.float32)
        else:
            # Large-c1 path: accumulate k*k per-tap matmuls in f32 -- no slab
            # write+read through VMEM; K = c1p already fills the MXU depth.
            y = None
            for ti, off in enumerate(offsets):
                part = jnp.dot(
                    w_ref[:, ti * c1p:(ti + 1) * c1p],
                    xbuf[slot, :, off:off + tile_lanes],
                    preferred_element_type=jnp.float32)
                y = part if y is None else y + part

        y = y + b_ref[...]                           # folded BN bias (c2, 1)
        if act:
            # SiLU with the EUP approximate reciprocal (frees VPU slots).
            y = y * pl.reciprocal(1.0 + jnp.exp(-y), approx=True)
        out_ref[0] = y.astype(out_ref.dtype)         # lane-dense store

    return kernel


def conv_forward(x, folded, *, k=3, s=1, g=1, d=1, act=True,
                 tile_lanes=None, n_splits=None, fuse_taps=None,
                 compute_dtype=jnp.bfloat16, out_dtype=jnp.float32):
    """Conv(c1, c2, k): conv(bias=False) + folded eval-mode BN + SiLU.

    x: (bs, c1, h, w) float32 NCHW.  Returns (bs, c2, h, w) in `out_dtype`.
    bf16 GEMM operands are a deliberate (inference) precision choice.
    """
    if s != 1 or g != 1 or d != 1 or k % 2 != 1:
        # TODO(synk): stride>1 / grouped / dilated / even-k conv not implemented.
        raise NotImplementedError("only odd-k, stride-1, dense 'same' conv")

    bs, c1, h, w = x.shape
    w_flat = folded["w_flat"]                        # (c2, k*k*c1p), BN folded
    c1p = int(folded["c1p"])
    c2, K = w_flat.shape
    assert K == k * k * c1p
    r = k // 2
    wp = w + 2 * r                                   # padded row width
    L = h * wp                                       # valid output lanes

    # Tile size: any multiple of 128 lanes works (tiles need not align to image
    # rows); target ~2048 lanes so the 2-row halo and per-step overhead amortise
    # and the MXU N dim is fed in full passes.
    if tile_lanes is None:
        tile_lanes = min(2048, _round_up(L, 128))
    tile_lanes = _round_up(int(tile_lanes), 128)
    n_tiles = _cdiv(L, tile_lanes)

    # Optional "split" axis so v7x's two TensorCores both get work at batch=1.
    if n_splits is None:
        n_splits = 2 if n_tiles >= 4 else 1
    n_splits = max(1, int(n_splits))
    tph = _cdiv(n_tiles, n_splits)                   # tiles per split
    n_tiles_pad = tph * n_splits
    l_pad = n_tiles_pad * tile_lanes

    maxoff = 2 * r * wp + 2 * r                      # largest tap offset
    win = tile_lanes + _round_up(maxoff, 128)        # haloed DMA window (lanes)
    in_len = (n_tiles_pad - 1) * tile_lanes + win    # padded flat input length

    # Single zero-padded, flattened activation copy (rows padded by r on each
    # side, r pad rows top/bottom) -- taps become pure lane offsets.
    xp = jnp.pad(x.astype(compute_dtype),
                 ((0, 0), (0, c1p - c1), (r, r), (r, r)))    # (bs,c1p,h+2r,wp)
    x_flat = xp.reshape(bs, c1p, (h + 2 * r) * wp)
    x_flat = jnp.pad(x_flat, ((0, 0), (0, 0), (0, in_len - (h + 2 * r) * wp)))

    w_c = w_flat.astype(compute_dtype)               # (c2, K)
    b_c = folded["b"].astype(jnp.float32)[:, None]   # (c2, 1)

    if fuse_taps is None:
        fuse_taps = c1p < 128                        # slab only for small stems

    kernel = _make_conv_kernel(wp, tile_lanes, win, k, tph, act, fuse_taps, c1p)

    # VMEM budget (xbuf + single-buffered weights + double-buffered out blocks
    # + f32 epilogue + optional slab), with headroom; capped for v7x's 64 MiB.
    isz_c = np.dtype(compute_dtype).itemsize
    isz_o = np.dtype(out_dtype).itemsize
    est = (2 * c1p * win * isz_c
           + c2 * K * isz_c
           + c2 * 128 * 4
           + 2 * c2 * tile_lanes * isz_o
           + c2 * tile_lanes * 4
           + (K * tile_lanes * isz_c if fuse_taps else 0))
    vmem_limit = int(min(max(2 * est, 16 << 20), 64 << 20))

    def run(single_buffer_consts):
        extra = dict(pipeline_mode=pl.Buffered(1)) if single_buffer_consts else {}
        return pl.pallas_call(
            kernel,
            out_shape=jax.ShapeDtypeStruct((bs, c2, l_pad), out_dtype),
            grid=(bs, n_splits, tph),
            in_specs=[
                pl.BlockSpec(memory_space=pl.ANY),     # raw HBM ref; manual DMA
                pl.BlockSpec((c2, K), lambda b, sp, t: (0, 0), **extra),
                pl.BlockSpec((c2, 1), lambda b, sp, t: (0, 0), **extra),
            ],
            out_specs=pl.BlockSpec((1, c2, tile_lanes),
                                   lambda b, sp, t: (b, 0, sp * tph + t)),
            scratch_shapes=[
                pltpu.VMEM((2, c1p, win), compute_dtype),   # double-buffered halo
                pltpu.SemaphoreType.DMA((2,)),
            ],
            compiler_params=pltpu.CompilerParams(
                dimension_semantics=("parallel", "parallel", "arbitrary"),
                vmem_limit_bytes=vmem_limit),
        )(x_flat, w_c, b_c)

    try:
        # Weight/bias index maps are grid-invariant -> single-buffer them.
        out_flat = run(True)
    except Exception:
        # Fallback for jax builds where pipeline_mode=Buffered(1) is unsupported.
        out_flat = run(False)

    out = out_flat[:, :, :h * wp].reshape(bs, c2, h, wp)[:, :, :, :w]
    return out


def make_conv_params(key, c1, c2, k):
    """Deterministic synthetic Conv2d(bias=False) + BatchNorm2d parameters."""
    ks = jax.random.split(key, 5)
    weight = 0.15 * jax.random.normal(ks[0], (c2, c1, k, k), jnp.float32)
    gamma = 1.0 + 0.1 * jax.random.normal(ks[1], (c2,), jnp.float32)
    beta = 0.1 * jax.random.normal(ks[2], (c2,), jnp.float32)
    mean = 0.1 * jax.random.normal(ks[3], (c2,), jnp.float32)
    var = jax.random.uniform(ks[4], (c2,), jnp.float32, minval=0.5, maxval=1.5)
    return dict(weight=weight, gamma=gamma, beta=beta, mean=mean, var=var)


def fold_conv_bn(raw, eps=1e-3, c1_pad_to=16):
    """Fold eval-mode BatchNorm into the conv weights (done once, offline).

    c1 is zero-padded to a multiple of `c1_pad_to` (bf16 sublane packing) so
    in-kernel tap loads / slab concat stay tile-aligned.
    """
    scale = raw["gamma"] / jnp.sqrt(raw["var"] + eps)
    w_oihw = raw["weight"] * scale[:, None, None, None]      # (c2, c1, k, k)
    bias = raw["beta"] - raw["mean"] * scale                 # (c2,)
    c2, c1, k, _ = raw["weight"].shape
    c1p = _round_up(c1, c1_pad_to)
    w_pad = jnp.pad(w_oihw, ((0, 0), (0, c1p - c1), (0, 0), (0, 0)))
    # Tap-major (ky, kx) flattening -- must match the kernel's offset ordering.
    w_flat = jnp.concatenate(
        [w_pad[:, :, ky, kx] for ky in range(k) for kx in range(k)], axis=1)
    return dict(w_flat=w_flat, b=bias, w_oihw=w_oihw, c1p=c1p)


def conv_reference_f32(x, raw, k=3, act=True, eps=1e-3):
    """Plain-JAX replica of the PyTorch module (f32, eval-mode BN)."""
    r = k // 2
    y = jax.lax.conv_general_dilated(
        x, raw["weight"], (1, 1), ((r, r), (r, r)),
        dimension_numbers=("NCHW", "OIHW", "NCHW"),
        precision=jax.lax.Precision.HIGHEST)
    scale = raw["gamma"] / jnp.sqrt(raw["var"] + eps)
    y = y * scale[None, :, None, None] \
        + (raw["beta"] - raw["mean"] * scale)[None, :, None, None]
    return y * jax.nn.sigmoid(y) if act else y


def conv_reference_bf16(x, folded, k=3, act=True):
    """Same operand rounding as the kernel: bf16 operands, f32 accumulation."""
    r = k // 2
    xb = x.astype(jnp.bfloat16).astype(jnp.float32)
    wb = folded["w_oihw"].astype(jnp.bfloat16).astype(jnp.float32)
    y = jax.lax.conv_general_dilated(
        xb, wb, (1, 1), ((r, r), (r, r)),
        dimension_numbers=("NCHW", "OIHW", "NCHW"),
        precision=jax.lax.Precision.HIGHEST)
    y = y + folded["b"][None, :, None, None]
    return y * jax.nn.sigmoid(y) if act else y


if __name__ == "__main__":
    bs, c1, c2, h, w, k = 2, 4, 8, 16, 16, 3

    key = jax.random.PRNGKey(0)
    kx, kp = jax.random.split(key)
    x = jax.random.normal(kx, (bs, c1, h, w), jnp.float32)
    raw = make_conv_params(kp, c1, c2, k)
    folded = fold_conv_bn(raw)

    ref_bf16 = conv_reference_bf16(x, folded, k=k, act=True)
    ref_f32 = conv_reference_f32(x, raw, k=k, act=True)

    # Run A: fused-slab path (stem-style small c1), small tiles + 2-way split so
    # the halo DMA, double-buffering and per-split priming paths are exercised.
    out_a = conv_forward(x, folded, k=k, act=True,
                         tile_lanes=128, n_splits=2, fuse_taps=True)
    out_a = jax.block_until_ready(out_a)
    assert out_a.shape == (bs, c2, h, w)

    # Run B: per-tap accumulation path (large-c1 strategy, forced here), bf16 out.
    out_b = conv_forward(x, folded, k=k, act=True,
                         tile_lanes=256, n_splits=1, fuse_taps=False,
                         out_dtype=jnp.bfloat16)
    out_b = jax.block_until_ready(out_b).astype(jnp.float32)
    assert out_b.shape == (bs, c2, h, w)

    # Tolerances account for bf16 operands, MXU accumulation order, the EUP
    # approximate reciprocal in SiLU, and (run B) bf16 output quantisation.
    err_a = float(jnp.max(jnp.abs(out_a - ref_bf16)))
    err_a_f32 = float(jnp.max(jnp.abs(out_a - ref_f32)))
    err_b = float(jnp.max(jnp.abs(out_b - ref_bf16)))
    err_b_f32 = float(jnp.max(jnp.abs(out_b - ref_f32)))

    if err_a > 5e-2:
        raise AssertionError(f"slab path mismatch vs bf16 reference: {err_a}")
    if err_a_f32 > 1.5e-1:
        raise AssertionError(f"slab path mismatch vs f32 reference: {err_a_f32}")
    if err_b > 6e-2:
        raise AssertionError(f"per-tap path mismatch vs bf16 reference: {err_b}")
    if err_b_f32 > 1.5e-1:
        raise AssertionError(f"per-tap path mismatch vs f32 reference: {err_b_f32}")
    print("KERNEL_OK")
</pallas_src>

<mosaic_0001>
module attributes {stable_mosaic.version = 11 : i64} {
  func.func @kernel(%arg0: i32, %arg1: i32, %arg2: i32, %arg3: memref<2x16x640xbf16, #tpu.memory_space<any>>, %arg4: memref<8x144xbf16, #tpu.memory_space<vmem>>, %arg5: memref<8x1xf32, #tpu.memory_space<vmem>>, %arg6: memref<1x8x128xf32, #tpu.memory_space<vmem>>, %arg7: memref<2x16x256xbf16, #tpu.memory_space<vmem>>, %arg8: memref<2x!tpu.dma_semaphore, #tpu.memory_space<semaphore_mem>>) attributes {dimension_semantics = [#tpu.dimension_semantics<parallel>, #tpu.dimension_semantics<parallel>, #tpu.dimension_semantics<arbitrary>], iteration_bounds = array<i64: 2, 2, 2>, scalar_prefetch = 0 : i64, scratch_operands = 2 : i64, tpu.core_type = #tpu.core_type<tc>, window_params = [{}, {pipeline_mode = #tpu.pipeline_mode<synchronous>, transform_indices = @transform_1, window_bounds = array<i64: 8, 144>}, {pipeline_mode = #tpu.pipeline_mode<synchronous>, transform_indices = @transform_2, window_bounds = array<i64: 8, 1>}, {transform_indices = @transform_3, window_bounds = array<i64: 1, 8, 128>}]} {
    %c2_i32 = arith.constant 2 : i32
    %0 = arith.muli %arg1, %c2_i32 : i32
    %1 = arith.addi %0, %arg2 : i32
    %c0_i32 = arith.constant 0 : i32
    %2 = arith.cmpi eq, %arg2, %c0_i32 : i32
    %3 = arith.extui %2 : i1 to i32
    %c0_i32_0 = arith.constant 0 : i32
    %4 = arith.cmpi ne, %3, %c0_i32_0 : i32
    scf.if %4 {
      %c128_i32 = arith.constant 128 : i32
      %68 = arith.muli %1, %c128_i32 : i32
      %69 = tpu.assume_multiple %68, 128 : i32
      %c0_i32_32 = arith.constant 0 : i32
      %c0_i32_33 = arith.constant 0 : i32
      %c0_i32_34 = arith.constant 0 : i32
      %70 = tpu.memref_slice %arg3[%arg0, %c0_i32_34, %69] : memref<2x16x640xbf16, #tpu.memory_space<any>> -> memref<1x16x256xbf16, #tpu.memory_space<any>>
      %71 = tpu.memref_squeeze %70 : memref<1x16x256xbf16, #tpu.memory_space<any>> -> memref<16x256xbf16, #tpu.memory_space<any>>
      %c0_i32_35 = arith.constant 0 : i32
      %c0_i32_36 = arith.constant 0 : i32
      %72 = tpu.memref_slice %arg7[%c0_i32_32, %c0_i32_35, %c0_i32_36] : memref<2x16x256xbf16, #tpu.memory_space<vmem>> -> memref<1x16x256xbf16, #tpu.memory_space<vmem>>
      %73 = tpu.memref_squeeze %72 : memref<1x16x256xbf16, #tpu.memory_space<vmem>> -> memref<16x256xbf16, #tpu.memory_space<vmem>>
      %74 = tpu.memref_slice %arg8[%c0_i32_33] : memref<2x!tpu.dma_semaphore, #tpu.memory_space<semaphore_mem>> -> memref<1x!tpu.dma_semaphore, #tpu.memory_space<semaphore_mem>>
      %75 = tpu.memref_squeeze %74 : memref<1x!tpu.dma_semaphore, #tpu.memory_space<semaphore_mem>> -> memref<!tpu.dma_semaphore, #tpu.memory_space<semaphore_mem>>
      tpu.enqueue_dma source(%71 : memref<16x256xbf16, #tpu.memory_space<any>>) target(%73 : memref<16x256xbf16, #tpu.memory_space<vmem>>) target_semaphore(%75 : memref<!tpu.dma_semaphore, #tpu.memory_space<semaphore_mem>>)
    } else {
    }
    %c2_i32_1 = arith.constant 2 : i32
    %c0_i32_2 = arith.constant 0 : i32
    %5 = arith.cmpi eq, %c2_i32_1, %c0_i32_2 : i32
    %c1_i32 = arith.constant 1 : i32
    %6 = arith.select %5, %c1_i32, %c2_i32_1 : i32
    %7 = arith.remsi %arg2, %6 : i32
    %c0_i32_3 = arith.constant 0 : i32
    %8 = arith.cmpi ne, %7, %c0_i32_3 : i32
    %c0_i32_4 = arith.constant 0 : i32
    %9 = arith.cmpi slt, %7, %c0_i32_4 : i32
    %c0_i32_5 = arith.constant 0 : i32
    %10 = arith.cmpi slt, %6, %c0_i32_5 : i32
    %11 = arith.xori %9, %10 : i1
    %12 = arith.andi %11, %8 : i1
    %13 = arith.addi %7, %6 : i32
    %14 = arith.select %12, %13, %7 : i32
    %c1_i32_6 = arith.constant 1 : i32
    %15 = arith.addi %arg2, %c1_i32_6 : i32
    %c2_i32_7 = arith.constant 2 : i32
    %16 = arith.cmpi slt, %15, %c2_i32_7 : i32
    %17 = arith.extui %16 : i1 to i32
    %c0_i32_8 = arith.constant 0 : i32
    %18 = arith.cmpi ne, %17, %c0_i32_8 : i32
    scf.if %18 {
      %c1_i32_32 = arith.constant 1 : i32
      %68 = arith.addi %1, %c1_i32_32 : i32
      %c1_i32_33 = arith.constant 1 : i32
      %69 = arith.subi %c1_i32_33, %14 : i32
      %c128_i32 = arith.constant 128 : i32
      %70 = arith.muli %68, %c128_i32 : i32
      %71 = tpu.assume_multiple %70, 128 : i32
      %c0_i32_34 = arith.constant 0 : i32
      %72 = tpu.memref_slice %arg3[%arg0, %c0_i32_34, %71] : memref<2x16x640xbf16, #tpu.memory_space<any>> -> memref<1x16x256xbf16, #tpu.memory_space<any>>
      %73 = tpu.memref_squeeze %72 : memref<1x16x256xbf16, #tpu.memory_space<any>> -> memref<16x256xbf16, #tpu.memory_space<any>>
      %c0_i32_35 = arith.constant 0 : i32
      %c0_i32_36 = arith.constant 0 : i32
      %74 = tpu.memref_slice %arg7[%69, %c0_i32_35, %c0_i32_36] : memref<2x16x256xbf16, #tpu.memory_space<vmem>> -> memref<1x16x256xbf16, #tpu.memory_space<vmem>>
      %75 = tpu.memref_squeeze %74 : memref<1x16x256xbf16, #tpu.memory_space<vmem>> -> memref<16x256xbf16, #tpu.memory_space<vmem>>
      %76 = tpu.memref_slice %arg8[%69] : memref<2x!tpu.dma_semaphore, #tpu.memory_space<semaphore_mem>> -> memref<1x!tpu.dma_semaphore, #tpu.memory_space<semaphore_mem>>
      %77 = tpu.memref_squeeze %76 : memref<1x!tpu.dma_semaphore, #tpu.memory_space<semaphore_mem>> -> memref<!tpu.dma_semaphore, #tpu.memory_space<semaphore_mem>>
      tpu.enqueue_dma source(%73 : memref<16x256xbf16, #tpu.memory_space<any>>) target(%75 : memref<16x256xbf16, #tpu.memory_space<vmem>>) target_semaphore(%77 : memref<!tpu.dma_semaphore, #tpu.memory_space<semaphore_mem>>)
    } else {
    }
    %c0_i32_9 = arith.constant 0 : i32
    %c0_i32_10 = arith.constant 0 : i32
    %c0_i32_11 = arith.constant 0 : i32
    %19 = tpu.memref_slice %arg3[%c0_i32_9, %c0_i32_10, %c0_i32_11] : memref<2x16x640xbf16, #tpu.memory_space<any>> -> memref<1x16x256xbf16, #tpu.memory_space<any>>
    %20 = tpu.memref_squeeze %19 : memref<1x16x256xbf16, #tpu.memory_space<any>> -> memref<16x256xbf16, #tpu.memory_space<any>>
    %c0_i32_12 = arith.constant 0 : i32
    %c0_i32_13 = arith.constant 0 : i32
    %21 = tpu.memref_slice %arg7[%14, %c0_i32_12, %c0_i32_13] : memref<2x16x256xbf16, #tpu.memory_space<vmem>> -> memref<1x16x256xbf16, #tpu.memory_space<vmem>>
    %22 = tpu.memref_squeeze %21 : memref<1x16x256xbf16, #tpu.memory_space<vmem>> -> memref<16x256xbf16, #tpu.memory_space<vmem>>
    %23 = tpu.memref_slice %arg8[%14] : memref<2x!tpu.dma_semaphore, #tpu.memory_space<semaphore_mem>> -> memref<1x!tpu.dma_semaphore, #tpu.memory_space<semaphore_mem>>
    %24 = tpu.memref_squeeze %23 : memref<1x!tpu.dma_semaphore, #tpu.memory_space<semaphore_mem>> -> memref<!tpu.dma_semaphore, #tpu.memory_space<semaphore_mem>>
    tpu.wait_dma2 semaphore(%24 : memref<!tpu.dma_semaphore, #tpu.memory_space<semaphore_mem>>) src(%20 : memref<16x256xbf16, #tpu.memory_space<any>>) dst(%22 : memref<16x256xbf16, #tpu.memory_space<vmem>>)
    %25 = arith.index_cast %14 : i32 to index
    %c0 = arith.constant 0 : index
    %c0_14 = arith.constant 0 : index
    %26 = vector.load %arg7[%25, %c0, %c0_14] : memref<2x16x256xbf16, #tpu.memory_space<vmem>>, vector<1x16x128xbf16>
    %27 = vector.shape_cast %26 : vector<1x16x128xbf16> to vector<16x128xbf16>
    %28 = arith.index_cast %14 : i32 to index
    %c0_15 = arith.constant 0 : index
    %c1 = arith.constant 1 : index
    %29 = vector.load %arg7[%28, %c0_15, %c1] : memref<2x16x256xbf16, #tpu.memory_space<vmem>>, vector<1x16x128xbf16>
    %30 = vector.shape_cast %29 : vector<1x16x128xbf16> to vector<16x128xbf16>
    %31 = arith.index_cast %14 : i32 to index
    %c0_16 = arith.constant 0 : index
    %c2 = arith.constant 2 : index
    %32 = vector.load %arg7[%31, %c0_16, %c2] : memref<2x16x256xbf16, #tpu.memory_space<vmem>>, vector<1x16x128xbf16>
    %33 = vector.shape_cast %32 : vector<1x16x128xbf16> to vector<16x128xbf16>
    %34 = arith.index_cast %14 : i32 to index
    %c0_17 = arith.constant 0 : index
    %c18 = arith.constant 18 : index
    %35 = vector.load %arg7[%34, %c0_17, %c18] : memref<2x16x256xbf16, #tpu.memory_space<vmem>>, vector<1x16x128xbf16>
    %36 = vector.shape_cast %35 : vector<1x16x128xbf16> to vector<16x128xbf16>
    %37 = arith.index_cast %14 : i32 to index
    %c0_18 = arith.constant 0 : index
    %c19 = arith.constant 19 : index
    %38 = vector.load %arg7[%37, %c0_18, %c19] : memref<2x16x256xbf16, #tpu.memory_space<vmem>>, vector<1x16x128xbf16>
    %39 = vector.shape_cast %38 : vector<1x16x128xbf16> to vector<16x128xbf16>
    %40 = arith.index_cast %14 : i32 to index
    %c0_19 = arith.constant 0 : index
    %c20 = arith.constant 20 : index
    %41 = vector.load %arg7[%40, %c0_19, %c20] : memref<2x16x256xbf16, #tpu.memory_space<vmem>>, vector<1x16x128xbf16>
    %42 = vector.shape_cast %41 : vector<1x16x128xbf16> to vector<16x128xbf16>
    %43 = arith.index_cast %14 : i32 to index
    %c0_20 = arith.constant 0 : index
    %c36 = arith.constant 36 : index
    %44 = vector.load %arg7[%43, %c0_20, %c36] : memref<2x16x256xbf16, #tpu.memory_space<vmem>>, vector<1x16x128xbf16>
    %45 = vector.shape_cast %44 : vector<1x16x128xbf16> to vector<16x128xbf16>
    %46 = arith.index_cast %14 : i32 to index
    %c0_21 = arith.constant 0 : index
    %c37 = arith.constant 37 : index
    %47 = vector.load %arg7[%46, %c0_21, %c37] : memref<2x16x256xbf16, #tpu.memory_space<vmem>>, vector<1x16x128xbf16>
    %48 = vector.shape_cast %47 : vector<1x16x128xbf16> to vector<16x128xbf16>
    %49 = arith.index_cast %14 : i32 to index
    %c0_22 = arith.constant 0 : index
    %c38 = arith.constant 38 : index
    %50 = vector.load %arg7[%49, %c0_22, %c38] : memref<2x16x256xbf16, #tpu.memory_space<vmem>>, vector<1x16x128xbf16>
    %51 = vector.shape_cast %50 : vector<1x16x128xbf16> to vector<16x128xbf16>
    %52 = tpu.concatenate %27, %30, %33, %36, %39, %42, %45, %48, %51 in 0 : vector<16x128xbf16>, vector<16x128xbf16>, vector<16x128xbf16>, vector<16x128xbf16>, vector<16x128xbf16>, vector<16x128xbf16>, vector<16x128xbf16>, vector<16x128xbf16>, vector<16x128xbf16> -> vector<144x128xbf16>
    %c0_23 = arith.constant 0 : index
    %c0_24 = arith.constant 0 : index
    %53 = vector.load %arg4[%c0_23, %c0_24] : memref<8x144xbf16, #tpu.memory_space<vmem>>, vector<8x144xbf16>
    %cst = arith.constant dense<0.000000e+00> : vector<8x128xf32>
    %54 = tpu.matmul %53, %52, %cst {dimension_numbers = #tpu.dot_dimension_numbers<[1], [0], [0], [1], [0, 0, 1, 1], [], []>} : vector<8x144xbf16>, vector<144x128xbf16>, vector<8x128xf32> -> vector<8x128xf32>
    %c0_25 = arith.constant 0 : index
    %c0_26 = arith.constant 0 : index
    %55 = vector.load %arg5[%c0_25, %c0_26] : memref<8x1xf32, #tpu.memory_space<vmem>>, vector<8x1xf32>
    %56 = vector.broadcast %55 : vector<8x1xf32> to vector<8x128xf32>
    %57 = arith.addf %54, %56 : vector<8x128xf32>
    %cst_27 = arith.constant 0.000000e+00 : f32
    %58 = vector.broadcast %cst_27 : f32 to vector<8x128xf32>
    %59 = arith.subf %58, %57 : vector<8x128xf32>
    %60 = math.exp %59 : vector<8x128xf32>
    %cst_28 = arith.constant 1.000000e+00 : f32
    %61 = vector.broadcast %cst_28 : f32 to vector<8x128xf32>
    %62 = arith.addf %61, %60 : vector<8x128xf32>
    %63 = tpu.reciprocal %62 {approx = true} : vector<8x128xf32> -> vector<8x128xf32>
    %64 = arith.mulf %57, %63 : vector<8x128xf32>
    %c0_29 = arith.constant 0 : index
    %c0_30 = arith.constant 0 : index
    %c0_31 = arith.constant 0 : index
    %65 = vector.load %arg6[%c0_29, %c0_30, %c0_31] : memref<1x8x128xf32, #tpu.memory_space<vmem>>, vector<1x8x128xf32>
    %66 = vector.shape_cast %65 : vector<1x8x128xf32> to vector<8x128xf32>
    %67 = vector.shape_cast %64 : vector<8x128xf32> to vector<1x8x128xf32>
    tpu.vector_store %arg6[%c0_29, %c0_30, %c0_31], %67 {strides = array<i32>} : memref<1x8x128xf32, #tpu.memory_space<vmem>>, vector<1x8x128xf32>,
    return
  }
  func.func @transform_1(%arg0: i32, %arg1: i32, %arg2: i32) -> (i32, i32) {
    %c0_i32 = arith.constant 0 : i32
    %c0_i32_0 = arith.constant 0 : i32
    %c0_i32_1 = arith.constant 0 : i32
    return %c0_i32, %c0_i32_0 : i32, i32
  }
  func.func @transform_2(%arg0: i32, %arg1: i32, %arg2: i32) -> (i32, i32) {
    %c0_i32 = arith.constant 0 : i32
    %c0_i32_0 = arith.constant 0 : i32
    %c0_i32_1 = arith.constant 0 : i32
    return %c0_i32, %c0_i32_0 : i32, i32
  }
  func.func @transform_3(%arg0: i32, %arg1: i32, %arg2: i32) -> (i32, i32, i32) {
    %c2_i32 = arith.constant 2 : i32
    %0 = arith.muli %arg1, %c2_i32 : i32
    %1 = arith.addi %0, %arg2 : i32
    %c0_i32 = arith.constant 0 : i32
    %c0_i32_0 = arith.constant 0 : i32
    return %arg0, %c0_i32, %1 : i32, i32, i32
  }
}

module attributes {stable_mosaic.version = 11 : i64} {
  func.func @kernel(%arg0: i32, %arg1: i32, %arg2: i32, %arg3: memref<2x16x640xbf16, #tpu.memory_space<any>>, %arg4: memref<8x144xbf16, #tpu.memory_space<vmem>>, %arg5: memref<8x1xf32, #tpu.memory_space<vmem>>, %arg6: memref<1x8x128xf32, #tpu.memory_space<vmem>>, %arg7: memref<2x16x256xbf16, #tpu.memory_space<vmem>>, %arg8: memref<2x!tpu.dma_semaphore, #tpu.memory_space<semaphore_mem>>) attributes {dimension_semantics = [#tpu.dimension_semantics<parallel>, #tpu.dimension_semantics<parallel>, #tpu.dimension_semantics<arbitrary>], iteration_bounds = array<i64: 2, 2, 2>, scalar_prefetch = 0 : i64, scratch_operands = 2 : i64, tpu.core_type = #tpu.core_type<tc>, window_params = [{}, {pipeline_mode = #tpu.pipeline_mode<synchronous>, transform_indices = @transform_1, window_bounds = array<i64: 8, 144>}, {pipeline_mode = #tpu.pipeline_mode<synchronous>, transform_indices = @transform_2, window_bounds = array<i64: 8, 1>}, {transform_indices = @transform_3, window_bounds = array<i64: 1, 8, 128>}]} {
    %c2_i32 = arith.constant 2 : i32
    %0 = arith.muli %arg1, %c2_i32 : i32
    %1 = arith.addi %0, %arg2 : i32
    %c0_i32 = arith.constant 0 : i32
    %2 = arith.cmpi eq, %arg2, %c0_i32 : i32
    %3 = arith.extui %2 : i1 to i32
    %c0_i32_0 = arith.constant 0 : i32
    %4 = arith.cmpi ne, %3, %c0_i32_0 : i32
    scf.if %4 {
      %c128_i32 = arith.constant 128 : i32
      %68 = arith.muli %1, %c128_i32 : i32
      %69 = tpu.assume_multiple %68, 128 : i32
      %c0_i32_32 = arith.constant 0 : i32
      %c0_i32_33 = arith.constant 0 : i32
      %c0_i32_34 = arith.constant 0 : i32
      %70 = tpu.memref_slice %arg3[%arg0, %c0_i32_34, %69] : memref<2x16x640xbf16, #tpu.memory_space<any>> -> memref<1x16x256xbf16, #tpu.memory_space<any>>
      %71 = tpu.memref_squeeze %70 : memref<1x16x256xbf16, #tpu.memory_space<any>> -> memref<16x256xbf16, #tpu.memory_space<any>>
      %c0_i32_35 = arith.constant 0 : i32
      %c0_i32_36 = arith.constant 0 : i32
      %72 = tpu.memref_slice %arg7[%c0_i32_32, %c0_i32_35, %c0_i32_36] : memref<2x16x256xbf16, #tpu.memory_space<vmem>> -> memref<1x16x256xbf16, #tpu.memory_space<vmem>>
      %73 = tpu.memref_squeeze %72 : memref<1x16x256xbf16, #tpu.memory_space<vmem>> -> memref<16x256xbf16, #tpu.memory_space<vmem>>
      %74 = tpu.memref_slice %arg8[%c0_i32_33] : memref<2x!tpu.dma_semaphore, #tpu.memory_space<semaphore_mem>> -> memref<1x!tpu.dma_semaphore, #tpu.memory_space<semaphore_mem>>
      %75 = tpu.memref_squeeze %74 : memref<1x!tpu.dma_semaphore, #tpu.memory_space<semaphore_mem>> -> memref<!tpu.dma_semaphore, #tpu.memory_space<semaphore_mem>>
      tpu.enqueue_dma source(%71 : memref<16x256xbf16, #tpu.memory_space<any>>) target(%73 : memref<16x256xbf16, #tpu.memory_space<vmem>>) target_semaphore(%75 : memref<!tpu.dma_semaphore, #tpu.memory_space<semaphore_mem>>)
    } else {
    }
    %c2_i32_1 = arith.constant 2 : i32
    %c0_i32_2 = arith.constant 0 : i32
    %5 = arith.cmpi eq, %c2_i32_1, %c0_i32_2 : i32
    %c1_i32 = arith.constant 1 : i32
    %6 = arith.select %5, %c1_i32, %c2_i32_1 : i32
    %7 = arith.remsi %arg2, %6 : i32
    %c0_i32_3 = arith.constant 0 : i32
    %8 = arith.cmpi ne, %7, %c0_i32_3 : i32
    %c0_i32_4 = arith.constant 0 : i32
    %9 = arith.cmpi slt, %7, %c0_i32_4 : i32
    %c0_i32_5 = arith.constant 0 : i32
    %10 = arith.cmpi slt, %6, %c0_i32_5 : i32
    %11 = arith.xori %9, %10 : i1
    %12 = arith.andi %11, %8 : i1
    %13 = arith.addi %7, %6 : i32
    %14 = arith.select %12, %13, %7 : i32
    %c1_i32_6 = arith.constant 1 : i32
    %15 = arith.addi %arg2, %c1_i32_6 : i32
    %c2_i32_7 = arith.constant 2 : i32
    %16 = arith.cmpi slt, %15, %c2_i32_7 : i32
    %17 = arith.extui %16 : i1 to i32
    %c0_i32_8 = arith.constant 0 : i32
    %18 = arith.cmpi ne, %17, %c0_i32_8 : i32
    scf.if %18 {
      %c1_i32_32 = arith.constant 1 : i32
      %68 = arith.addi %1, %c1_i32_32 : i32
      %c1_i32_33 = arith.constant 1 : i32
      %69 = arith.subi %c1_i32_33, %14 : i32
      %c128_i32 = arith.constant 128 : i32
      %70 = arith.muli %68, %c128_i32 : i32
      %71 = tpu.assume_multiple %70, 128 : i32
      %c0_i32_34 = arith.constant 0 : i32
      %72 = tpu.memref_slice %arg3[%arg0, %c0_i32_34, %71] : memref<2x16x640xbf16, #tpu.memory_space<any>> -> memref<1x16x256xbf16, #tpu.memory_space<any>>
      %73 = tpu.memref_squeeze %72 : memref<1x16x256xbf16, #tpu.memory_space<any>> -> memref<16x256xbf16, #tpu.memory_space<any>>
      %c0_i32_35 = arith.constant 0 : i32
      %c0_i32_36 = arith.constant 0 : i32
      %74 = tpu.memref_slice %arg7[%69, %c0_i32_35, %c0_i32_36] : memref<2x16x256xbf16, #tpu.memory_space<vmem>> -> memref<1x16x256xbf16, #tpu.memory_space<vmem>>
      %75 = tpu.memref_squeeze %74 : memref<1x16x256xbf16, #tpu.memory_space<vmem>> -> memref<16x256xbf16, #tpu.memory_space<vmem>>
      %76 = tpu.memref_slice %arg8[%69] : memref<2x!tpu.dma_semaphore, #tpu.memory_space<semaphore_mem>> -> memref<1x!tpu.dma_semaphore, #tpu.memory_space<semaphore_mem>>
      %77 = tpu.memref_squeeze %76 : memref<1x!tpu.dma_semaphore, #tpu.memory_space<semaphore_mem>> -> memref<!tpu.dma_semaphore, #tpu.memory_space<semaphore_mem>>
      tpu.enqueue_dma source(%73 : memref<16x256xbf16, #tpu.memory_space<any>>) target(%75 : memref<16x256xbf16, #tpu.memory_space<vmem>>) target_semaphore(%77 : memref<!tpu.dma_semaphore, #tpu.memory_space<semaphore_mem>>)
    } else {
    }
    %c0_i32_9 = arith.constant 0 : i32
    %c0_i32_10 = arith.constant 0 : i32
    %c0_i32_11 = arith.constant 0 : i32
    %19 = tpu.memref_slice %arg3[%c0_i32_9, %c0_i32_10, %c0_i32_11] : memref<2x16x640xbf16, #tpu.memory_space<any>> -> memref<1x16x256xbf16, #tpu.memory_space<any>>
    %20 = tpu.memref_squeeze %19 : memref<1x16x256xbf16, #tpu.memory_space<any>> -> memref<16x256xbf16, #tpu.memory_space<any>>
    %c0_i32_12 = arith.constant 0 : i32
    %c0_i32_13 = arith.constant 0 : i32
    %21 = tpu.memref_slice %arg7[%14, %c0_i32_12, %c0_i32_13] : memref<2x16x256xbf16, #tpu.memory_space<vmem>> -> memref<1x16x256xbf16, #tpu.memory_space<vmem>>
    %22 = tpu.memref_squeeze %21 : memref<1x16x256xbf16, #tpu.memory_space<vmem>> -> memref<16x256xbf16, #tpu.memory_space<vmem>>
    %23 = tpu.memref_slice %arg8[%14] : memref<2x!tpu.dma_semaphore, #tpu.memory_space<semaphore_mem>> -> memref<1x!tpu.dma_semaphore, #tpu.memory_space<semaphore_mem>>
    %24 = tpu.memref_squeeze %23 : memref<1x!tpu.dma_semaphore, #tpu.memory_space<semaphore_mem>> -> memref<!tpu.dma_semaphore, #tpu.memory_space<semaphore_mem>>
    tpu.wait_dma2 semaphore(%24 : memref<!tpu.dma_semaphore, #tpu.memory_space<semaphore_mem>>) src(%20 : memref<16x256xbf16, #tpu.memory_space<any>>) dst(%22 : memref<16x256xbf16, #tpu.memory_space<vmem>>)
    %25 = arith.index_cast %14 : i32 to index
    %c0 = arith.constant 0 : index
    %c0_14 = arith.constant 0 : index
    %26 = vector.load %arg7[%25, %c0, %c0_14] : memref<2x16x256xbf16, #tpu.memory_space<vmem>>, vector<1x16x128xbf16>
    %27 = vector.shape_cast %26 : vector<1x16x128xbf16> to vector<16x128xbf16>
    %28 = arith.index_cast %14 : i32 to index
    %c0_15 = arith.constant 0 : index
    %c1 = arith.constant 1 : index
    %29 = vector.load %arg7[%28, %c0_15, %c1] : memref<2x16x256xbf16, #tpu.memory_space<vmem>>, vector<1x16x128xbf16>
    %30 = vector.shape_cast %29 : vector<1x16x128xbf16> to vector<16x128xbf16>
    %31 = arith.index_cast %14 : i32 to index
    %c0_16 = arith.constant 0 : index
    %c2 = arith.constant 2 : index
    %32 = vector.load %arg7[%31, %c0_16, %c2] : memref<2x16x256xbf16, #tpu.memory_space<vmem>>, vector<1x16x128xbf16>
    %33 = vector.shape_cast %32 : vector<1x16x128xbf16> to vector<16x128xbf16>
    %34 = arith.index_cast %14 : i32 to index
    %c0_17 = arith.constant 0 : index
    %c18 = arith.constant 18 : index
    %35 = vector.load %arg7[%34, %c0_17, %c18] : memref<2x16x256xbf16, #tpu.memory_space<vmem>>, vector<1x16x128xbf16>
    %36 = vector.shape_cast %35 : vector<1x16x128xbf16> to vector<16x128xbf16>
    %37 = arith.index_cast %14 : i32 to index
    %c0_18 = arith.constant 0 : index
    %c19 = arith.constant 19 : index
    %38 = vector.load %arg7[%37, %c0_18, %c19] : memref<2x16x256xbf16, #tpu.memory_space<vmem>>, vector<1x16x128xbf16>
    %39 = vector.shape_cast %38 : vector<1x16x128xbf16> to vector<16x128xbf16>
    %40 = arith.index_cast %14 : i32 to index
    %c0_19 = arith.constant 0 : index
    %c20 = arith.constant 20 : index
    %41 = vector.load %arg7[%40, %c0_19, %c20] : memref<2x16x256xbf16, #tpu.memory_space<vmem>>, vector<1x16x128xbf16>
    %42 = vector.shape_cast %41 : vector<1x16x128xbf16> to vector<16x128xbf16>
    %43 = arith.index_cast %14 : i32 to index
    %c0_20 = arith.constant 0 : index
    %c36 = arith.constant 36 : index
    %44 = vector.load %arg7[%43, %c0_20, %c36] : memref<2x16x256xbf16, #tpu.memory_space<vmem>>, vector<1x16x128xbf16>
    %45 = vector.shape_cast %44 : vector<1x16x128xbf16> to vector<16x128xbf16>
    %46 = arith.index_cast %14 : i32 to index
    %c0_21 = arith.constant 0 : index
    %c37 = arith.constant 37 : index
    %47 = vector.load %arg7[%46, %c0_21, %c37] : memref<2x16x256xbf16, #tpu.memory_space<vmem>>, vector<1x16x128xbf16>
    %48 = vector.shape_cast %47 : vector<1x16x128xbf16> to vector<16x128xbf16>
    %49 = arith.index_cast %14 : i32 to index
    %c0_22 = arith.constant 0 : index
    %c38 = arith.constant 38 : index
    %50 = vector.load %arg7[%49, %c0_22, %c38] : memref<2x16x256xbf16, #tpu.memory_space<vmem>>, vector<1x16x128xbf16>
    %51 = vector.shape_cast %50 : vector<1x16x128xbf16> to vector<16x128xbf16>
    %52 = tpu.concatenate %27, %30, %33, %36, %39, %42, %45, %48, %51 in 0 : vector<16x128xbf16>, vector<16x128xbf16>, vector<16x128xbf16>, vector<16x128xbf16>, vector<16x128xbf16>, vector<16x128xbf16>, vector<16x128xbf16>, vector<16x128xbf16>, vector<16x128xbf16> -> vector<144x128xbf16>
    %c0_23 = arith.constant 0 : index
    %c0_24 = arith.constant 0 : index
    %53 = vector.load %arg4[%c0_23, %c0_24] : memref<8x144xbf16, #tpu.memory_space<vmem>>, vector<8x144xbf16>
    %cst = arith.constant dense<0.000000e+00> : vector<8x128xf32>
    %54 = tpu.matmul %53, %52, %cst {dimension_numbers = #tpu.dot_dimension_numbers<[1], [0], [0], [1], [0, 0, 1, 1], [], []>} : vector<8x144xbf16>, vector<144x128xbf16>, vector<8x128xf32> -> vector<8x128xf32>
    %c0_25 = arith.constant 0 : index
    %c0_26 = arith.constant 0 : index
    %55 = vector.load %arg5[%c0_25, %c0_26] : memref<8x1xf32, #tpu.memory_space<vmem>>, vector<8x1xf32>
    %56 = vector.broadcast %55 : vector<8x1xf32> to vector<8x128xf32>
    %57 = arith.addf %54, %56 : vector<8x128xf32>
    %cst_27 = arith.constant 0.000000e+00 : f32
    %58 = vector.broadcast %cst_27 : f32 to vector<8x128xf32>
    %59 = arith.subf %58, %57 : vector<8x128xf32>
    %60 = math.exp %59 : vector<8x128xf32>
    %cst_28 = arith.constant 1.000000e+00 : f32
    %61 = vector.broadcast %cst_28 : f32 to vector<8x128xf32>
    %62 = arith.addf %61, %60 : vector<8x128xf32>
    %63 = tpu.reciprocal %62 {approx = true} : vector<8x128xf32> -> vector<8x128xf32>
    %64 = arith.mulf %57, %63 : vector<8x128xf32>
    %c0_29 = arith.constant 0 : index
    %c0_30 = arith.constant 0 : index
    %c0_31 = arith.constant 0 : index
    %65 = vector.load %arg6[%c0_29, %c0_30, %c0_31] : memref<1x8x128xf32, #tpu.memory_space<vmem>>, vector<1x8x128xf32>
    %66 = vector.shape_cast %65 : vector<1x8x128xf32> to vector<8x128xf32>
    %67 = vector.shape_cast %64 : vector<8x128xf32> to vector<1x8x128xf32>
    tpu.vector_store %arg6[%c0_29, %c0_30, %c0_31], %67 {strides = array<i32>} : memref<1x8x128xf32, #tpu.memory_space<vmem>>, vector<1x8x128xf32>,
    return
  }
  func.func @transform_1(%arg0: i32, %arg1: i32, %arg2: i32) -> (i32, i32) {
    %c0_i32 = arith.constant 0 : i32
    %c0_i32_0 = arith.constant 0 : i32
    %c0_i32_1 = arith.constant 0 : i32
    return %c0_i32, %c0_i32_0 : i32, i32
  }
  func.func @transform_2(%arg0: i32, %arg1: i32, %arg2: i32) -> (i32, i32) {
    %c0_i32 = arith.constant 0 : i32
    %c0_i32_0 = arith.constant 0 : i32
    %c0_i32_1 = arith.constant 0 : i32
    return %c0_i32, %c0_i32_0 : i32, i32
  }
  func.func @transform_3(%arg0: i32, %arg1: i32, %arg2: i32) -> (i32, i32, i32) {
    %c2_i32 = arith.constant 2 : i32
    %0 = arith.muli %arg1, %c2_i32 : i32
    %1 = arith.addi %0, %arg2 : i32
    %c0_i32 = arith.constant 0 : i32
    %c0_i32_0 = arith.constant 0 : i32
    return %arg0, %c0_i32, %1 : i32, i32, i32
  }
}

</mosaic_0001>

<bundles_post_ra>
// kernel: tpu_custom_call.1
= control target key start
LH: loop header
LB: loop body
LE: loop exit
PB: predicated region body
PF: predicated region fallthrough
CT: control target
= control target key end

     0   :  { %8 = vsyncpa [#allocation5], 0  ;;  %s1061_s0 = inlined_call_operand.hbm [shape: bf16[2,16,640], index: 0, kind: input, shape index: {}]   ;;  %s1062_s1 = inlined_call_operand.vmem [shape: bf16[8,144], index: 1, kind: input, shape index: {}]   ;;  %s1063_s2 = inlined_call_operand.vmem [shape: f32[8,1], index: 2, kind: input, shape index: {}]   ;;  %s1064_s3 = inlined_call_operand.hbm [shape: f32[2,8,512], index: 3, kind: output, shape index: {}]  }
   0x1   :  { %10 = vsyncpa [#allocation5 + $0x1], 0  ;;  %s821_s12 = smov 0   ;;  %s823_s13 = smov 0  }
   0x2   :  { %s825_s14 = smov 0   ;;  %s827_s15 = smov 0  }
   0x3   :  { %s829_s16 = smov 0   ;;  %s831_s17 = smov 0  }
   0x4   :  { %s833_s18 = smov 0   ;;  %s835_s19 = smov 0  }
   0x5   :  { %s837_s20 = smov 0   ;;  %s839_s21 = smov 0  }
   0x6 LB: > { %1078 = sst [smem:[#allocation10_spill]] %s750_s12  ;;  %s457_s22 = sadd.s32 4294967295, %s786_s21   ;;  %s786_s21 = sphi %s839_s21, %s16_s21   ;;  %s782_s20 = sphi %s837_s20, %s1105_s20   ;;  %s778_s19 = sphi %s835_s19, %s1104_s19   ;;  %s774_s18 = sphi %s833_s18, %s1108_s18   ;;  %s770_s17 = sphi %s831_s17, %s1102_s17   ;;  %s766_s16 = sphi %s829_s16, %s1101_s16   ;;  %s762_s15 = sphi %s827_s15, %s1100_s15   ;;  %s758_s14 = sphi %s825_s14, %s1099_s14   ;;  %s754_s13 = sphi %s823_s13, %s1107_s13   ;;  %s750_s12 = sphi %s821_s12, %s1106_s12  }
   0x7   : > { %1079 = sst [smem:[#allocation11_spill]] %s758_s14  ;;  %s458_s23 = sadd.s32 4294967294, %s786_s21  }
   0x8   : > { %1080 = sst [smem:[#allocation12_spill]] %s774_s18  ;;  %s28_s24 = sadd.s32 1, %s774_s18 }
   0x9   : > { %1081 = sst [smem:[#allocation13_spill]] %s778_s19  ;;  %p29_p0 = scmp.ge.s32.totalorder %s28_s24, 2 }
   0xa   : > { %1082 = sst [smem:[#allocation14_spill]] %s782_s20  ;;  %s31_s25 = sadd.s32 1, %s778_s19 }
   0xb   : > { %s35_s26 = sadd.s32 1, %s782_s20  ;;  %s459_s27 = sshll.u32 %s778_s19, 1 }
   0xc   : > { %s1110_s24 = smov (%p29_p0, %s28_s24), 0  ;;  %s1112_s25 = smov (!%p29_p0, %s31_s25), %s778_s19 }
   0xd   : > { %1083 = sst [smem:[#allocation15_spill]] %s1110_s24  ;;  %s82_s28 = sadd.s32 %s774_s18, %s459_s27 }
   0xe   : > { %p100_p1 = scmp.ne.s32.totalorder %s758_s14, %s754_s13  ;;  %p33_p2 = scmp.ge.s32.totalorder %s1112_s25, 2 }
   0xf   : > { %p101_p3 = scmp.eq.s32.totalorder %s457_s22, 7  ;;  %p106_p4 = scmp.ne.s32.totalorder %s754_s13, %s750_s12 }
  0x10   : > { %p107_p5 = scmp.eq.s32.totalorder %s458_s23, 7  ;;  %s1114_s25 = smov (%p33_p2, %s1112_s25), 0 }
  0x11   : > { %1084 = sst [smem:[#allocation16_spill]] %s1114_s25  ;;  %s1116_s26 = smov (!%p33_p2, %s35_s26), %s782_s20 }
  0x12   : > { %s460_s29 = sshll.u32 %s1114_s25, 1  ;;  %p889_p6 = por %p101_p3, %p100_p1 }
  0x13   : > { %p37_p7 = scmp.ge.s32.totalorder %s1116_s26, 2  ;;  %s84_s4 = sadd.s32 %s460_s29, %s1110_s24 }
  0x14   : > { %s86_s5 = ssub.s32 %s82_s28, %s84_s4  ;;  %p894_p8 = por %p107_p5, %p106_p4 }
  0x15   : > { %s1118_s26 = smov (%p37_p7, %s1116_s26), 0  ;;  %p462_p9 = scmp.ge.s32.totalorder %s786_s21, 1 }
  0x16   : > { %s1086_s6 = scalar_select %p894_p8, 1, 0 }
  0x17   : > { %1088 = sst [smem:[#allocation18_spill]] %s1118_s26  ;;  %p131_p10 = scmp.lt.s32.totalorder %s786_s21, 9 }
  0x18   : > { %1087 = sst [smem:[#allocation17_spill]] %s1086_s6  ;;  %s85_s7 = ssub.s32 %s782_s20, %s1118_s26 }
  0x19   : > { %s90_s8 = sadd.s32 1, %s758_s14  ;;  %s87_s9 = sor.u32 %s86_s5, %s85_s7 }
  0x1a   : > { %p132_p11 = pnand %p462_p9, %p131_p10  ;;  %p88_p12 = scmp.eq.s32.totalorder %s87_s9, 0 }
  0x1b   : > { %s1066_s11 = sand.u32 (!%p132_p11), 1, %s754_s13   ;;  %s464_s22 = sshll.u32 (!%p132_p11), %s766_s16, 1 }
  0x1c   : > { %s906_s10 = scalar_select %p88_p12, %s758_s14, %s90_s8  }
  0x1d   : > { %135 = sbr.rel (%p132_p11) target bundleno = 403 (0x193), region = 28  ;;  %s912_s23 = sshll.u32 (!%p132_p11), %s1066_s11, 3 }
  0x1e   : > { %1089 = sst [smem:[#allocation19_spill]] %s906_s10  ;;  %s915_s27 = sadd.s32 (!%p132_p11), %s762_s15, %s464_s22 }
  0x1f   : > { %p516_p13 = scmp.eq.s32.totalorder (!%p132_p11), %s762_s15, 0  ;;  %s466_s28 = sshll.u32 (!%p132_p11), %s915_s27, 7 }
  0x20   : > { %s158_s29 = sshra.s32 (!%p132_p11), %s466_s28, 7  ;;  %s1070_s4 = smul.u32 (!%p132_p11), 10, %s770_s17 }
  0x21   : > { %s1071_s7 = smov (!%p132_p11), [#allocation2]   ;;  %s500_s22 = sadd.s32 (!%p132_p11), 128, %s466_s28 }
  0x22   : > { %s161_s5 = sadd.s32 %s1070_s4, %s158_s29  ;;  %s166_s8 = sshll.u32 %s1071_s7, 4  ;;  %s167_s8 = int_to_ptr.vmem [resolvable:$true] %s166_s8 }
  0x23   : > { %s467_s9 = sshll.u32 %s161_s5, 2  ;;  %s1073_s7 = scalar_lea.hbm %s1061_s0, 80 }
  0x24   : > { %s163_s11 = scalar_lea.hbm %s1061_s0, %s467_s9 }
  0x25   : > { %s164_s25 = sshll.u32 %s163_s11, 4  ;;  %s165_s25 = int_to_ptr.hbm [resolvable:$true] %s164_s25 }
  0x26   : > { %s618_s24 = sshra.s32 %s165_s25, 4  ;;  %s619_s24 = int_to_ptr.hbm [resolvable:$true] %s618_s24 }
  0x27   : > { %s620_s20 = scalar_lea.hbm %s619_s24, 16  ;;  %p625_p3 = scmp.lt.s32.totalorder %s619_s24, %s1061_s0 }
  0x28   : > { %p621_p0 = scmp.ne.s32.totalorder %s619_s24, %s620_s20  ;;  %p626_p4 = scmp.lt.s32.totalorder %s1073_s7, %s620_s20 }
  0x2a   : > { %p622_p1 = pnand %p621_p0, %p516_p13  ;;  %p627_p5 = por %p626_p4, %p625_p3 }
  0x2c   : > { %p623_p2 = pneg %p622_p1 }
  0x2e   : > { %p628_p7 = pnand %p627_p5, %p623_p2 }
  0x30   : > { %631 = shalt.err (!%p628_p7)  }
  0x31   : > { %s789_s11 = smov 320   ;;  %s790_s28 = smov 128  }
  0x32   : > { %s791_s4 = smov 8   ;;  %s192_s19 = sshra.s32 %s500_s22, 7 }
  0x33   : > { %507 = dma.hbm_to_vmem [thread:$0]  (%p516_p13), %s165_s25, 256, %s167_s8, [#allocation3], %s789_s11, %s790_s28, %s791_s4 }
  0x34   : > { %p172_p9 = scmp.lt.s32.totalorder %s762_s15, 0  ;;  %s1090_s20 = smul.u32 10, %s770_s17 }
  0x35   : > { %s173_s16 = ssub.s32 0, %s762_s15  ;;  %s184_s14 = sadd.s32 1, %s762_s15 }
  0x36   : > { %s195_s24 = sadd.s32 %s192_s19, %s1090_s20  ;;  %s468_s5 = smin.u32 %s762_s15, %s173_s16 }
  0x37   : > { %s473_s29 = sshll.u32 %s195_s24, 2  ;;  %s175_s26 = sand.u32 1, %s468_s5  }
  0x38   : > { %s197_s18 = scalar_lea.hbm %s1061_s0, %s473_s29  ;;  %s176_s10 = ssub.s32 0, %s175_s26 }
  0x39   : > { %s1120_s10 = smov (!%p172_p9, %s176_s10), %s175_s26  ;;  %s202_s6 = sshll.u32 %s197_s18, 4  ;;  %s954_s6 = int_to_ptr.hbm [resolvable:$true] %s202_s6 }
  0x3a   : > { %p470_p10 = scmp.lt.s32.totalorder %s1120_s10, 0  ;;  %s182_s12 = sadd.s32 2, %s1120_s10 }
  0x3b   : > { %p956_p11 = scmp.lt.s32.totalorder %s184_s14, 2  ;;  %s1092_s5 = scalar_lea.hbm %s1061_s0, 80 }
  0x3c   : > { %s1122_s12 = smov (!%p470_p10, %s182_s12), %s1120_s10  ;;  %s646_s10 = sshra.s32 %s954_s6, 4  ;;  %s647_s10 = int_to_ptr.hbm [resolvable:$true] %s646_s10 }
  0x3d   : > { %s190_s7 = ssub.s32 1, %s1122_s12  ;;  %s502_s8 = sshll.u32 %s1122_s12, 4 }
  0x3e   : > { %s501_s22 = sshll.u32 %s190_s7, 4  ;;  %s201_s18 = scalar_lea.sflag [#allocation3], %s190_s7 }
  0x3f   : > { %s200_s15 = scalar_lea.vmem [#allocation2], %s501_s22  ;;  %s648_s20 = scalar_lea.hbm %s647_s10, 16 }
  0x40   : > { %s962_s19 = sshll.u32 %s200_s15, 4  ;;  %p649_p12 = scmp.ne.s32.totalorder %s647_s10, %s648_s20  ;;  %s205_s19 = int_to_ptr.vmem [resolvable:$true] %s962_s19 }
  0x41   : > { %p653_p1 = scmp.lt.s32.totalorder %s647_s10, %s1061_s0  ;;  %p654_p2 = scmp.lt.s32.totalorder %s1092_s5, %s648_s20 }
  0x42   : > { %p650_p13 = pnand %p649_p12, %p956_p11 }
  0x43   : > { %p655_p3 = por %p654_p2, %p653_p1 }
  0x44   : > { %p651_p0 = pneg %p650_p13 }
  0x46   : > { %p656_p4 = pnand %p655_p3, %p651_p0 }
  0x48   : > { %659 = shalt.err (!%p656_p4)  }
  0x49   : > { %s660_s26 = sshra.s32 %s205_s19, 4  ;;  %s1093_s7 = smov [#allocation2]   ;;  %s661_s26 = int_to_ptr.vmem [resolvable:$true] %s660_s26 }
  0x4a   : > { %s662_s9 = scalar_lea.vmem %s661_s26, 16  ;;  %s666_s22 = scalar_lea.vmem %s1093_s7, 32 }
  0x4b   : > { %p663_p5 = scmp.ne.s32.totalorder %s661_s26, %s662_s9  ;;  %p667_p10 = scmp.lt.s32.totalorder %s661_s26, [#allocation2] }
  0x4c   : > { %p668_p12 = scmp.lt.s32.totalorder %s666_s22, %s662_s9 }
  0x4d   : > { %p664_p7 = pnand %p663_p5, %p956_p11 }
  0x4e   : > { %p669_p13 = por %p668_p12, %p667_p10 }
  0x4f   : > { %p665_p9 = pneg %p664_p7 }
  0x51   : > { %p670_p8 = pnand %p669_p13, %p665_p9 }
  0x53   : > { %673 = shalt.err (!%p670_p8)  }
  0x54   : > { %509 = dma.hbm_to_vmem [thread:$0]  (%p956_p11), %s954_s6, 256, %s205_s19, %s201_s18, %s789_s11, %s790_s28, %s791_s4 }
  0x55   : > { %s147_s15 = scalar_lea.vmem [#allocation4], %s912_s23  ;;  %s991_s10 = scalar_lea.vmem [#allocation2], %s502_s8 }
  0x56   : > { %s213_s20 = scalar_lea.sflag [#allocation3], %s1122_s12 }
  0x57   : > { %742 = dma.done.wait %s213_s20, 256 }
  0x58   : > { %743 = vsyncadd %s213_s20, 4294967040  ;;  %v484_v0 = vld [vmem:[%s991_s10] sm:$0xf]  ;;  %v505_v1 = vld [vmem:[%s991_s10 + $0x4] sm:$0xf0]  ;;  %s792_s25 = smov 92  }
  0x59   : > { %v485_v2 = vor.u32 %v505_v1, %v484_v0  ;;  %s793_s14 = smov 91   ;;  %v504_v3 = vld [vmem:[%s991_s10 + $0x4] sm:$0xf]  ;;  %v486_v4 = vld [vmem:[%s991_s10 + $0x8] sm:$0xf0]  ;;  %s794_s6 = smov 108  }
  0x5a   : > { %v489_v5 = vor.u32 %v504_v3, %v486_v4  ;;  %s795_s12 = smov 109   ;;  %s796_s11 = smov 110   ;;  %vm282_vm0 = vcmask 744448   ;;  %vm275_vm1 = vcmask 752640   ;;  %v293_v14 = vld [vmem:[%s1063_s2] sm:$0xff]  ;;  %vm268_vm2 = vcmask 883712  }
  0x5b   : > { %271 = vrot.lane.b32.xlu1 %v485_v2, %s792_s25  ;;  %278 = vrot.lane.b32.xlu0 %v485_v2, %s793_s14  ;;  %s797_s28 = smov 126   ;;  %s798_s4 = smov 127   ;;  %v800_v15 = vmov 0   ;;  %vm261_vm3 = vcmask 891904   ;;  %vm254_vm4 = vcmask 900096   ;;  %vm247_vm5 = vcmask 1031168  }
  0x5c   : > { %264 = vrot.lane.b32.xlu2 %v485_v2, %s794_s6  ;;  %s799_s8 = smov 90   ;;  %612 = vset.pattern.permute.xlu1 %v800_v15  ;;  %vm240_vm6 = vcmask 1039360   ;;  %v292_v26 = vld [vmem:[%s1062_s1] sm:$0xff]  ;;  %v503_v28 = vld [vmem:[%s991_s10 + $0x4] sm:$0xf0]  ;;  %vm289_vm7 = vcmask 736256  }
  0x5d   : > { %613 = vset.pattern.permute.xlu0 %v800_v15  ;;  %v480_v27 = vld [vmem:[%s991_s10] sm:$0xf]  ;;  %v300_v32 = vunpack.c.l.b16 %v292_v26  ;;  %v301_v34 = vunpack.c.h.b16 %v292_v26  ;;  %vm305_vm8 = vcmask 130048   ;;  %s493_s29 = sshll.u32 %s770_s17, 2  ;;  %s359_s10 = sshll.u32 %s147_s15, 4  ;;  %s360_s10 = int_to_ptr.vmem [resolvable:$true] %s359_s10 }
  0x5e   : > { %v481_v33 = vor.u32 %v503_v28, %v480_v27  ;;  %s355_s5 = sadd.s32 %s493_s29, %s915_s27  ;;  %s1094_s17 = sand.u32 1, %s754_s13  }
  0x5f   : > { %v302_v35 = vpack.c.b16 %v300_v32, %v300_v32  ;;  %v303_v39 = vpack.c.b16 %v301_v34, %v301_v34  ;;  %s494_s26 = sshll.u32 %s355_s5, 3  ;;  %s343_s27 = scalar_lea.sflag [#allocation5], %s1094_s17 }
  0x60   : > { %s357_s22 = scalar_lea.hbm %s1064_s3, %s494_s26 }
  0x61   : > { %s361_s20 = sshll.u32 %s357_s22, 4  ;;  %s362_s20 = int_to_ptr.hbm [resolvable:$true] %s361_s20 }
  0x63   : > { %273 = vrot.lane.b32.xlu1 %v489_v5, %s792_s25  ;;  %280 = vrot.lane.b32.xlu0 %v489_v5, %s793_s14  ;;  %s688_s25 = sshra.s32 %s362_s20, 4  ;;  %s689_s25 = int_to_ptr.hbm [resolvable:$true] %s688_s25 }
  0x64   : > { %266 = vrot.lane.b32.xlu2 %v489_v5, %s794_s6  ;;  %s690_s14 = scalar_lea.hbm %s689_s25, 8  ;;  %p695_p1 = scmp.lt.s32.totalorder %s689_s25, %s1064_s3 }
  0x65   : > { %p691_p8 = scmp.ne.s32.totalorder %s689_s25, %s690_s14 }
  0x67   : > { %p692_p11 = pnand %p691_p8, %p889_p6 }
  0x69   : > { %p693_p0 = pneg %p692_p11 }
  0x6b   : > { %259 = vrot.lane.b32.xlu1 %v489_v5, %s795_s12  ;;  %257 = vrot.lane.b32.xlu0 %v485_v2, %s795_s12 }
  0x6c   : > { %250 = vrot.lane.b32.xlu2 %v485_v2, %s796_s11 }
  0x73   : > { %243 = vrot.lane.b32.xlu1 %v485_v2, %s797_s28  ;;  %252 = vrot.lane.b32.xlu0 %v489_v5, %s796_s11  ;;  %s694_s11 = scalar_lea.hbm %s1064_s3, 64 }
  0x74   : > { %245 = vrot.lane.b32.xlu2 %v489_v5, %s797_s28  ;;  %p696_p2 = scmp.lt.s32.totalorder %s694_s11, %s690_s14 }
  0x76   : > { %p697_p3 = por %p696_p2, %p695_p1 }
  0x78   : > { %p698_p4 = pnand %p697_p3, %p693_p0 }
  0x7b   : > { %238 = vrot.lane.b32.xlu1 %v489_v5, %s798_s4  ;;  %236 = vrot.lane.b32.xlu0 %v485_v2, %s798_s4 }
  0x7c   : > { %285 = vrot.lane.b32.xlu2 %v485_v2, %s799_s8 }
  0x83   : > { %287 = vrot.lane.b32.xlu0 %v489_v5, %s799_s8  ;;  %296 = vperm.xlu1 %612, %v293_v14  }
  0xb6   : > { %v265_v6 = vpop.permute.xlu2 %264 }
  0xbe   : > { %v267_v9 = vpop.permute.xlu2 %266 }
  0xbf   : > { %v269_v19 = vsel %vm268_vm2, %v265_v6, %v267_v9 }
  0xc6   : > { %v251_v16 = vpop.permute.xlu2 %250 }
  0xcd   : > { %v272_v7 = vpop.permute.xlu1 %271  ;;  %v279_v8 = vpop.permute.xlu0 %278 }
  0xce   : > { %v246_v24 = vpop.permute.xlu2 %245 }
  0xd5   : > { %v274_v10 = vpop.permute.xlu1 %273  ;;  %v281_v11 = vpop.permute.xlu0 %280 }
  0xd6   : > { %v283_v12 = vsel %vm282_vm0, %v279_v8, %v281_v11  ;;  %v276_v13 = vsel %vm275_vm1, %v272_v7, %v274_v10  ;;  %v286_v36 = vpop.permute.xlu2 %285 }
  0xd7   : > { %309 = vmatpush.bf16.msra.mxu0 %v283_v12 }
  0xdb   : > { %310 = vmatpush.bf16.msra.mxu0 %v276_v13 }
  0xdd   : > { %v260_v17 = vpop.permute.xlu1 %259  ;;  %v258_v18 = vpop.permute.xlu0 %257 }
  0xde   : > { %v262_v20 = vsel %vm261_vm3, %v258_v18, %v260_v17 }
  0xdf   : > { %311 = vmatpush.bf16.msra.mxu0 %v269_v19 }
  0xe3   : > { %312 = vmatpush.bf16.msra.mxu0 %v262_v20 }
  0xe5   : > { %v244_v21 = vpop.permute.xlu1 %243  ;;  %v253_v22 = vpop.permute.xlu0 %252 }
  0xe6   : > { %v255_v23 = vsel %vm254_vm4, %v251_v16, %v253_v22  ;;  %v248_v25 = vsel %vm247_vm5, %v244_v21, %v246_v24 }
  0xe7   : > { %313 = vmatpush.bf16.msra.mxu0 %v255_v23 }
  0xeb   : > { %314 = vmatpush.bf16.msra.mxu0 %v248_v25 }
  0xed   : > { %v239_v29 = vpop.permute.xlu1 %238  ;;  %v237_v30 = vpop.permute.xlu0 %236 }
  0xee   : > { %v241_v31 = vsel %vm240_vm6, %v237_v30, %v239_v29 }
  0xef   : > { %315 = vmatpush.bf16.msra.mxu0 %v241_v31 }
  0xf3   : > { %316 = vmatpush.bf16.msra.mxu0 %v481_v33 }
  0xf5   : > { %v288_v37 = vpop.permute.xlu0 %287  ;;  %v297_v40 = vpop.permute.xlu1 %296 }
  0xf6   : > { %317 = vmatmul.bf16.vlgmr.msra.gmra.mxu0 %v302_v35  ;;  %v290_v38 = vsel %vm289_vm7, %v286_v36, %v288_v37 }
  0xf7   : > { %329 = vmatpush.bf16.msra.mxu1 %v290_v38 }
  0xfa   : > { %490 = vmatmul.msk.bf16.vlgmr.msra.gmra.mxu1 %vm305_vm8, %v303_v39 }
 0x173   : > { %v318_v41 = vpop.f32.mrf.mxu0 }
 0x174   : > { %v319_v42 = vadd.f32 %v318_v41, %v297_v40 }
 0x177   : > { %v331_v43 = vpop.f32.mrf.mxu1 }
 0x178   : > { %v332_v44 = vadd.f32 %v331_v43, %v319_v42 }
 0x17a   : > { %v335_v45 = vsub.f32 0.0, %v332_v44 }
 0x17b   : > { %v320_v46 = vpop.f32.mrf.mxu0 }
 0x17c   : > { %v336_v47 = vmul.f32 1.442695, %v335_v45 }
 0x17e   : > { %614 = vpow2.f32 %v336_v47 }
 0x17f   : > { %v333_v48 = vpop.f32.mrf.mxu1 }
 0x184   : > { %v615_v49 = vpop.eup %614 }
 0x185   : > { %v338_v50 = vadd.f32 1.0, %v615_v49 }
 0x187   : > { %616 = vrcp.f32 %v338_v50 }
 0x18d   : > { %v617_v51 = vpop.eup %616 }
 0x18e   : > { %v340_v52 = vmul.f32 %v617_v51, %v332_v44 }
 0x190   : > { %341 = vst [vmem:[%s147_s15] sm:$0xff] %v340_v52 }
 0x191   : > { %701 = shalt.err (!%p698_p4)
}
 0x192   : > { %510 = dma.vmem_to_hbm [thread:$0]  (%p889_p6), %s360_s10, 128, %s362_s20, %s343_s27  }
 0x193 PF: > { %s1095_s23 = sld [smem:[#allocation10_spill]]  ;;  %p518_p5 = scmp.ge.s32.totalorder %s786_s21, 2 }
 0x194   : > { %s1096_s15 = sld [smem:[#allocation17_spill]] }
 0x199   : > { %s373_s8 = sand.u32 1, %s1095_s23  }
 0x19a   : > { %p1097_p7 = scmp.ne.s32.totalorder %s1096_s15, 0  ;;  %s374_s19 = scalar_lea.sflag [#allocation5], %s373_s8 }
 0x19c   : > { %p513_p9 = pnand %p518_p5, %p1097_p7 }
 0x19e   : > { %p514_p10 = pneg %p513_p9 }
 0x1a0   : > { %745 = dma.done.wait (%p514_p10), %s374_s19, 128  }
 0x1a1   : > { %747 = vsyncadd (%p514_p10), %s374_s19, 4294967168  ;;  %s16_s21 = sadd.s32 1, %s786_s21   ;;  %s1098_s18 = sld [smem:[#allocation11_spill]] }
 0x1a2   : > { %p13_p12 = scmp.ge.s32.totalorder %s16_s21, 10   ;;  %s1099_s14 = sld [smem:[#allocation19_spill]] }
 0x1a3   : > { %s1100_s15 = sld [smem:[#allocation12_spill]]  ;;  %s1106_s12 = smov %s754_s13 }
 0x1a4   : > { %s1101_s16 = sld [smem:[#allocation13_spill]] }
 0x1a5   : > { %s1102_s17 = sld [smem:[#allocation14_spill]] }
 0x1a6   : > { %s1103_s30 = sld [smem:[#allocation15_spill]] }
 0x1a7   : > { %s1104_s19 = sld [smem:[#allocation16_spill]]  ;;  %s1107_s13 = smov %s1098_s18 }
 0x1a8   : > { %s1105_s20 = sld [smem:[#allocation18_spill]]  ;;  %15 = sbr.rel (!%p13_p12) target bundleno = 6 (0x6), region = 75 }
 0x1ac   : > { %s1108_s18 = smov %s1103_s30 }
 0x1ad   :  { %380 = vsyncpa [#allocation5], 1 }
 0x1ae   :  { %382 = vsyncpa [#allocation5 + $0x1], 1 }
 0x1af   :  { %383 = vsyncmov [#allocation3] }
 0x1b2   :  { %s384_s24 = vpop.sfrf %383 }
 0x1b3   :  { %p497_p6 = scmp.ne.s32.totalorder %s384_s24, 0 }
 0x1b5   :  { %388 = shalt.err (%p497_p6)  }
 0x1b6   :  { %390 = vsyncmov [#allocation3 + $0x1] }
 0x1b9   :  { %s391_s29 = vpop.sfrf %390 }
 0x1ba   :  { %p498_p13 = scmp.ne.s32.totalorder %s391_s29, 0 }
 0x1bc   :  { %395 = shalt.err (%p498_p13)  }

// kernel: tpu_custom_call.1
= control target key start
LH: loop header
LB: loop body
LE: loop exit
PB: predicated region body
PF: predicated region fallthrough
CT: control target
= control target key end

     0   :  { %8 = vsyncpa [#allocation5], 0  ;;  %s1061_s0 = inlined_call_operand.hbm [shape: bf16[2,16,640], index: 0, kind: input, shape index: {}]   ;;  %s1062_s1 = inlined_call_operand.vmem [shape: bf16[8,144], index: 1, kind: input, shape index: {}]   ;;  %s1063_s2 = inlined_call_operand.vmem [shape: f32[8,1], index: 2, kind: input, shape index: {}]   ;;  %s1064_s3 = inlined_call_operand.hbm [shape: f32[2,8,512], index: 3, kind: output, shape index: {}]  }
   0x1   :  { %10 = vsyncpa [#allocation5 + $0x1], 0  ;;  %s821_s12 = smov 0   ;;  %s823_s13 = smov 0  }
   0x2   :  { %s825_s14 = smov 0   ;;  %s827_s15 = smov 0  }
   0x3   :  { %s829_s16 = smov 0   ;;  %s831_s17 = smov 0  }
   0x4   :  { %s833_s18 = smov 0   ;;  %s835_s19 = smov 0  }
   0x5   :  { %s837_s20 = smov 0   ;;  %s839_s21 = smov 0  }
   0x6 LB: > { %1078 = sst [smem:[#allocation10_spill]] %s750_s12  ;;  %s457_s22 = sadd.s32 4294967295, %s786_s21   ;;  %s786_s21 = sphi %s839_s21, %s16_s21   ;;  %s782_s20 = sphi %s837_s20, %s1105_s20   ;;  %s778_s19 = sphi %s835_s19, %s1104_s19   ;;  %s774_s18 = sphi %s833_s18, %s1108_s18   ;;  %s770_s17 = sphi %s831_s17, %s1102_s17   ;;  %s766_s16 = sphi %s829_s16, %s1101_s16   ;;  %s762_s15 = sphi %s827_s15, %s1100_s15   ;;  %s758_s14 = sphi %s825_s14, %s1099_s14   ;;  %s754_s13 = sphi %s823_s13, %s1107_s13   ;;  %s750_s12 = sphi %s821_s12, %s1106_s12  }
   0x7   : > { %1079 = sst [smem:[#allocation11_spill]] %s758_s14  ;;  %s458_s23 = sadd.s32 4294967294, %s786_s21  }
   0x8   : > { %1080 = sst [smem:[#allocation12_spill]] %s774_s18  ;;  %s28_s24 = sadd.s32 1, %s774_s18 }
   0x9   : > { %1081 = sst [smem:[#allocation13_spill]] %s778_s19  ;;  %p29_p0 = scmp.ge.s32.totalorder %s28_s24, 2 }
   0xa   : > { %1082 = sst [smem:[#allocation14_spill]] %s782_s20  ;;  %s31_s25 = sadd.s32 1, %s778_s19 }
   0xb   : > { %s35_s26 = sadd.s32 1, %s782_s20  ;;  %s459_s27 = sshll.u32 %s778_s19, 1 }
   0xc   : > { %s1110_s24 = smov (%p29_p0, %s28_s24), 0  ;;  %s1112_s25 = smov (!%p29_p0, %s31_s25), %s778_s19 }
   0xd   : > { %1083 = sst [smem:[#allocation15_spill]] %s1110_s24  ;;  %s82_s28 = sadd.s32 %s774_s18, %s459_s27 }
   0xe   : > { %p100_p1 = scmp.ne.s32.totalorder %s758_s14, %s754_s13  ;;  %p33_p2 = scmp.ge.s32.totalorder %s1112_s25, 2 }
   0xf   : > { %p101_p3 = scmp.eq.s32.totalorder %s457_s22, 7  ;;  %p106_p4 = scmp.ne.s32.totalorder %s754_s13, %s750_s12 }
  0x10   : > { %p107_p5 = scmp.eq.s32.totalorder %s458_s23, 7  ;;  %s1114_s25 = smov (%p33_p2, %s1112_s25), 0 }
  0x11   : > { %1084 = sst [smem:[#allocation16_spill]] %s1114_s25  ;;  %s1116_s26 = smov (!%p33_p2, %s35_s26), %s782_s20 }
  0x12   : > { %s460_s29 = sshll.u32 %s1114_s25, 1  ;;  %p889_p6 = por %p101_p3, %p100_p1 }
  0x13   : > { %p37_p7 = scmp.ge.s32.totalorder %s1116_s26, 2  ;;  %s84_s4 = sadd.s32 %s460_s29, %s1110_s24 }
  0x14   : > { %s86_s5 = ssub.s32 %s82_s28, %s84_s4  ;;  %p894_p8 = por %p107_p5, %p106_p4 }
  0x15   : > { %s1118_s26 = smov (%p37_p7, %s1116_s26), 0  ;;  %p462_p9 = scmp.ge.s32.totalorder %s786_s21, 1 }
  0x16   : > { %s1086_s6 = scalar_select %p894_p8, 1, 0 }
  0x17   : > { %1088 = sst [smem:[#allocation18_spill]] %s1118_s26  ;;  %p131_p10 = scmp.lt.s32.totalorder %s786_s21, 9 }
  0x18   : > { %1087 = sst [smem:[#allocation17_spill]] %s1086_s6  ;;  %s85_s7 = ssub.s32 %s782_s20, %s1118_s26 }
  0x19   : > { %s90_s8 = sadd.s32 1, %s758_s14  ;;  %s87_s9 = sor.u32 %s86_s5, %s85_s7 }
  0x1a   : > { %p132_p11 = pnand %p462_p9, %p131_p10  ;;  %p88_p12 = scmp.eq.s32.totalorder %s87_s9, 0 }
  0x1b   : > { %s1066_s11 = sand.u32 (!%p132_p11), 1, %s754_s13   ;;  %s464_s22 = sshll.u32 (!%p132_p11), %s766_s16, 1 }
  0x1c   : > { %s906_s10 = scalar_select %p88_p12, %s758_s14, %s90_s8  }
  0x1d   : > { %135 = sbr.rel (%p132_p11) target bundleno = 403 (0x193), region = 28  ;;  %s912_s23 = sshll.u32 (!%p132_p11), %s1066_s11, 3 }
  0x1e   : > { %1089 = sst [smem:[#allocation19_spill]] %s906_s10  ;;  %s915_s27 = sadd.s32 (!%p132_p11), %s762_s15, %s464_s22 }
  0x1f   : > { %p516_p13 = scmp.eq.s32.totalorder (!%p132_p11), %s762_s15, 0  ;;  %s466_s28 = sshll.u32 (!%p132_p11), %s915_s27, 7 }
  0x20   : > { %s158_s29 = sshra.s32 (!%p132_p11), %s466_s28, 7  ;;  %s1070_s4 = smul.u32 (!%p132_p11), 10, %s770_s17 }
  0x21   : > { %s1071_s7 = smov (!%p132_p11), [#allocation2]   ;;  %s500_s22 = sadd.s32 (!%p132_p11), 128, %s466_s28 }
  0x22   : > { %s161_s5 = sadd.s32 %s1070_s4, %s158_s29  ;;  %s166_s8 = sshll.u32 %s1071_s7, 4  ;;  %s167_s8 = int_to_ptr.vmem [resolvable:$true] %s166_s8 }
  0x23   : > { %s467_s9 = sshll.u32 %s161_s5, 2  ;;  %s1073_s7 = scalar_lea.hbm %s1061_s0, 80 }
  0x24   : > { %s163_s11 = scalar_lea.hbm %s1061_s0, %s467_s9 }
  0x25   : > { %s164_s25 = sshll.u32 %s163_s11, 4  ;;  %s165_s25 = int_to_ptr.hbm [resolvable:$true] %s164_s25 }
  0x26   : > { %s618_s24 = sshra.s32 %s165_s25, 4  ;;  %s619_s24 = int_to_ptr.hbm [resolvable:$true] %s618_s24 }
  0x27   : > { %s620_s20 = scalar_lea.hbm %s619_s24, 16  ;;  %p625_p3 = scmp.lt.s32.totalorder %s619_s24, %s1061_s0 }
  0x28   : > { %p621_p0 = scmp.ne.s32.totalorder %s619_s24, %s620_s20  ;;  %p626_p4 = scmp.lt.s32.totalorder %s1073_s7, %s620_s20 }
  0x2a   : > { %p622_p1 = pnand %p621_p0, %p516_p13  ;;  %p627_p5 = por %p626_p4, %p625_p3 }
  0x2c   : > { %p623_p2 = pneg %p622_p1 }
  0x2e   : > { %p628_p7 = pnand %p627_p5, %p623_p2 }
  0x30   : > { %631 = shalt.err (!%p628_p7)  }
  0x31   : > { %s789_s11 = smov 320   ;;  %s790_s28 = smov 128  }
  0x32   : > { %s791_s4 = smov 8   ;;  %s192_s19 = sshra.s32 %s500_s22, 7 }
  0x33   : > { %507 = dma.hbm_to_vmem [thread:$0]  (%p516_p13), %s165_s25, 256, %s167_s8, [#allocation3], %s789_s11, %s790_s28, %s791_s4 }
  0x34   : > { %p172_p9 = scmp.lt.s32.totalorder %s762_s15, 0  ;;  %s1090_s20 = smul.u32 10, %s770_s17 }
  0x35   : > { %s173_s16 = ssub.s32 0, %s762_s15  ;;  %s184_s14 = sadd.s32 1, %s762_s15 }
  0x36   : > { %s195_s24 = sadd.s32 %s192_s19, %s1090_s20  ;;  %s468_s5 = smin.u32 %s762_s15, %s173_s16 }
  0x37   : > { %s473_s29 = sshll.u32 %s195_s24, 2  ;;  %s175_s26 = sand.u32 1, %s468_s5  }
  0x38   : > { %s197_s18 = scalar_lea.hbm %s1061_s0, %s473_s29  ;;  %s176_s10 = ssub.s32 0, %s175_s26 }
  0x39   : > { %s1120_s10 = smov (!%p172_p9, %s176_s10), %s175_s26  ;;  %s202_s6 = sshll.u32 %s197_s18, 4  ;;  %s954_s6 = int_to_ptr.hbm [resolvable:$true] %s202_s6 }
  0x3a   : > { %p470_p10 = scmp.lt.s32.totalorder %s1120_s10, 0  ;;  %s182_s12 = sadd.s32 2, %s1120_s10 }
  0x3b   : > { %p956_p11 = scmp.lt.s32.totalorder %s184_s14, 2  ;;  %s1092_s5 = scalar_lea.hbm %s1061_s0, 80 }
  0x3c   : > { %s1122_s12 = smov (!%p470_p10, %s182_s12), %s1120_s10  ;;  %s646_s10 = sshra.s32 %s954_s6, 4  ;;  %s647_s10 = int_to_ptr.hbm [resolvable:$true] %s646_s10 }
  0x3d   : > { %s190_s7 = ssub.s32 1, %s1122_s12  ;;  %s502_s8 = sshll.u32 %s1122_s12, 4 }
  0x3e   : > { %s501_s22 = sshll.u32 %s190_s7, 4  ;;  %s201_s18 = scalar_lea.sflag [#allocation3], %s190_s7 }
  0x3f   : > { %s200_s15 = scalar_lea.vmem [#allocation2], %s501_s22  ;;  %s648_s20 = scalar_lea.hbm %s647_s10, 16 }
  0x40   : > { %s962_s19 = sshll.u32 %s200_s15, 4  ;;  %p649_p12 = scmp.ne.s32.totalorder %s647_s10, %s648_s20  ;;  %s205_s19 = int_to_ptr.vmem [resolvable:$true] %s962_s19 }
  0x41   : > { %p653_p1 = scmp.lt.s32.totalorder %s647_s10, %s1061_s0  ;;  %p654_p2 = scmp.lt.s32.totalorder %s1092_s5, %s648_s20 }
  0x42   : > { %p650_p13 = pnand %p649_p12, %p956_p11 }
  0x43   : > { %p655_p3 = por %p654_p2, %p653_p1 }
  0x44   : > { %p651_p0 = pneg %p650_p13 }
  0x46   : > { %p656_p4 = pnand %p655_p3, %p651_p0 }
  0x48   : > { %659 = shalt.err (!%p656_p4)  }
  0x49   : > { %s660_s26 = sshra.s32 %s205_s19, 4  ;;  %s1093_s7 = smov [#allocation2]   ;;  %s661_s26 = int_to_ptr.vmem [resolvable:$true] %s660_s26 }
  0x4a   : > { %s662_s9 = scalar_lea.vmem %s661_s26, 16  ;;  %s666_s22 = scalar_lea.vmem %s1093_s7, 32 }
  0x4b   : > { %p663_p5 = scmp.ne.s32.totalorder %s661_s26, %s662_s9  ;;  %p667_p10 = scmp.lt.s32.totalorder %s661_s26, [#allocation2] }
  0x4c   : > { %p668_p12 = scmp.lt.s32.totalorder %s666_s22, %s662_s9 }
  0x4d   : > { %p664_p7 = pnand %p663_p5, %p956_p11 }
  0x4e   : > { %p669_p13 = por %p668_p12, %p667_p10 }
  0x4f   : > { %p665_p9 = pneg %p664_p7 }
  0x51   : > { %p670_p8 = pnand %p669_p13, %p665_p9 }
  0x53   : > { %673 = shalt.err (!%p670_p8)  }
  0x54   : > { %509 = dma.hbm_to_vmem [thread:$0]  (%p956_p11), %s954_s6, 256, %s205_s19, %s201_s18, %s789_s11, %s790_s28, %s791_s4 }
  0x55   : > { %s147_s15 = scalar_lea.vmem [#allocation4], %s912_s23  ;;  %s991_s10 = scalar_lea.vmem [#allocation2], %s502_s8 }
  0x56   : > { %s213_s20 = scalar_lea.sflag [#allocation3], %s1122_s12 }
  0x57   : > { %742 = dma.done.wait %s213_s20, 256 }
  0x58   : > { %743 = vsyncadd %s213_s20, 4294967040  ;;  %v484_v0 = vld [vmem:[%s991_s10] sm:$0xf]  ;;  %v505_v1 = vld [vmem:[%s991_s10 + $0x4] sm:$0xf0]  ;;  %s792_s25 = smov 92  }
  0x59   : > { %v485_v2 = vor.u32 %v505_v1, %v484_v0  ;;  %s793_s14 = smov 91   ;;  %v504_v3 = vld [vmem:[%s991_s10 + $0x4] sm:$0xf]  ;;  %v486_v4 = vld [vmem:[%s991_s10 + $0x8] sm:$0xf0]  ;;  %s794_s6 = smov 108  }
  0x5a   : > { %v489_v5 = vor.u32 %v504_v3, %v486_v4  ;;  %s795_s12 = smov 109   ;;  %s796_s11 = smov 110   ;;  %vm282_vm0 = vcmask 744448   ;;  %vm275_vm1 = vcmask 752640   ;;  %v293_v14 = vld [vmem:[%s1063_s2] sm:$0xff]  ;;  %vm268_vm2 = vcmask 883712  }
  0x5b   : > { %271 = vrot.lane.b32.xlu1 %v485_v2, %s792_s25  ;;  %278 = vrot.lane.b32.xlu0 %v485_v2, %s793_s14  ;;  %s797_s28 = smov 126   ;;  %s798_s4 = smov 127   ;;  %v800_v15 = vmov 0   ;;  %vm261_vm3 = vcmask 891904   ;;  %vm254_vm4 = vcmask 900096   ;;  %vm247_vm5 = vcmask 1031168  }
  0x5c   : > { %264 = vrot.lane.b32.xlu2 %v485_v2, %s794_s6  ;;  %s799_s8 = smov 90   ;;  %612 = vset.pattern.permute.xlu1 %v800_v15  ;;  %vm240_vm6 = vcmask 1039360   ;;  %v292_v26 = vld [vmem:[%s1062_s1] sm:$0xff]  ;;  %v503_v28 = vld [vmem:[%s991_s10 + $0x4] sm:$0xf0]  ;;  %vm289_vm7 = vcmask 736256  }
  0x5d   : > { %613 = vset.pattern.permute.xlu0 %v800_v15  ;;  %v480_v27 = vld [vmem:[%s991_s10] sm:$0xf]  ;;  %v300_v32 = vunpack.c.l.b16 %v292_v26  ;;  %v301_v34 = vunpack.c.h.b16 %v292_v26  ;;  %vm305_vm8 = vcmask 130048   ;;  %s493_s29 = sshll.u32 %s770_s17, 2  ;;  %s359_s10 = sshll.u32 %s147_s15, 4  ;;  %s360_s10 = int_to_ptr.vmem [resolvable:$true] %s359_s10 }
  0x5e   : > { %v481_v33 = vor.u32 %v503_v28, %v480_v27  ;;  %s355_s5 = sadd.s32 %s493_s29, %s915_s27  ;;  %s1094_s17 = sand.u32 1, %s754_s13  }
  0x5f   : > { %v302_v35 = vpack.c.b16 %v300_v32, %v300_v32  ;;  %v303_v39 = vpack.c.b16 %v301_v34, %v301_v34  ;;  %s494_s26 = sshll.u32 %s355_s5, 3  ;;  %s343_s27 = scalar_lea.sflag [#allocation5], %s1094_s17 }
  0x60   : > { %s357_s22 = scalar_lea.hbm %s1064_s3, %s494_s26 }
  0x61   : > { %s361_s20 = sshll.u32 %s357_s22, 4  ;;  %s362_s20 = int_to_ptr.hbm [resolvable:$true] %s361_s20 }
  0x63   : > { %273 = vrot.lane.b32.xlu1 %v489_v5, %s792_s25  ;;  %280 = vrot.lane.b32.xlu0 %v489_v5, %s793_s14  ;;  %s688_s25 = sshra.s32 %s362_s20, 4  ;;  %s689_s25 = int_to_ptr.hbm [resolvable:$true] %s688_s25 }
  0x64   : > { %266 = vrot.lane.b32.xlu2 %v489_v5, %s794_s6  ;;  %s690_s14 = scalar_lea.hbm %s689_s25, 8  ;;  %p695_p1 = scmp.lt.s32.totalorder %s689_s25, %s1064_s3 }
  0x65   : > { %p691_p8 = scmp.ne.s32.totalorder %s689_s25, %s690_s14 }
  0x67   : > { %p692_p11 = pnand %p691_p8, %p889_p6 }
  0x69   : > { %p693_p0 = pneg %p692_p11 }
  0x6b   : > { %259 = vrot.lane.b32.xlu1 %v489_v5, %s795_s12  ;;  %257 = vrot.lane.b32.xlu0 %v485_v2, %s795_s12 }
  0x6c   : > { %250 = vrot.lane.b32.xlu2 %v485_v2, %s796_s11 }
  0x73   : > { %243 = vrot.lane.b32.xlu1 %v485_v2, %s797_s28  ;;  %252 = vrot.lane.b32.xlu0 %v489_v5, %s796_s11  ;;  %s694_s11 = scalar_lea.hbm %s1064_s3, 64 }
  0x74   : > { %245 = vrot.lane.b32.xlu2 %v489_v5, %s797_s28  ;;  %p696_p2 = scmp.lt.s32.totalorder %s694_s11, %s690_s14 }
  0x76   : > { %p697_p3 = por %p696_p2, %p695_p1 }
  0x78   : > { %p698_p4 = pnand %p697_p3, %p693_p0 }
  0x7b   : > { %238 = vrot.lane.b32.xlu1 %v489_v5, %s798_s4  ;;  %236 = vrot.lane.b32.xlu0 %v485_v2, %s798_s4 }
  0x7c   : > { %285 = vrot.lane.b32.xlu2 %v485_v2, %s799_s8 }
  0x83   : > { %287 = vrot.lane.b32.xlu0 %v489_v5, %s799_s8  ;;  %296 = vperm.xlu1 %612, %v293_v14  }
  0xb6   : > { %v265_v6 = vpop.permute.xlu2 %264 }
  0xbe   : > { %v267_v9 = vpop.permute.xlu2 %266 }
  0xbf   : > { %v269_v19 = vsel %vm268_vm2, %v265_v6, %v267_v9 }
  0xc6   : > { %v251_v16 = vpop.permute.xlu2 %250 }
  0xcd   : > { %v272_v7 = vpop.permute.xlu1 %271  ;;  %v279_v8 = vpop.permute.xlu0 %278 }
  0xce   : > { %v246_v24 = vpop.permute.xlu2 %245 }
  0xd5   : > { %v274_v10 = vpop.permute.xlu1 %273  ;;  %v281_v11 = vpop.permute.xlu0 %280 }
  0xd6   : > { %v283_v12 = vsel %vm282_vm0, %v279_v8, %v281_v11  ;;  %v276_v13 = vsel %vm275_vm1, %v272_v7, %v274_v10  ;;  %v286_v36 = vpop.permute.xlu2 %285 }
  0xd7   : > { %309 = vmatpush.bf16.msra.mxu0 %v283_v12 }
  0xdb   : > { %310 = vmatpush.bf16.msra.mxu0 %v276_v13 }
  0xdd   : > { %v260_v17 = vpop.permute.xlu1 %259  ;;  %v258_v18 = vpop.permute.xlu0 %257 }
  0xde   : > { %v262_v20 = vsel %vm261_vm3, %v258_v18, %v260_v17 }
  0xdf   : > { %311 = vmatpush.bf16.msra.mxu0 %v269_v19 }
  0xe3   : > { %312 = vmatpush.bf16.msra.mxu0 %v262_v20 }
  0xe5   : > { %v244_v21 = vpop.permute.xlu1 %243  ;;  %v253_v22 = vpop.permute.xlu0 %252 }
  0xe6   : > { %v255_v23 = vsel %vm254_vm4, %v251_v16, %v253_v22  ;;  %v248_v25 = vsel %vm247_vm5, %v244_v21, %v246_v24 }
  0xe7   : > { %313 = vmatpush.bf16.msra.mxu0 %v255_v23 }
  0xeb   : > { %314 = vmatpush.bf16.msra.mxu0 %v248_v25 }
  0xed   : > { %v239_v29 = vpop.permute.xlu1 %238  ;;  %v237_v30 = vpop.permute.xlu0 %236 }
  0xee   : > { %v241_v31 = vsel %vm240_vm6, %v237_v30, %v239_v29 }
  0xef   : > { %315 = vmatpush.bf16.msra.mxu0 %v241_v31 }
  0xf3   : > { %316 = vmatpush.bf16.msra.mxu0 %v481_v33 }
  0xf5   : > { %v288_v37 = vpop.permute.xlu0 %287  ;;  %v297_v40 = vpop.permute.xlu1 %296 }
  0xf6   : > { %317 = vmatmul.bf16.vlgmr.msra.gmra.mxu0 %v302_v35  ;;  %v290_v38 = vsel %vm289_vm7, %v286_v36, %v288_v37 }
  0xf7   : > { %329 = vmatpush.bf16.msra.mxu1 %v290_v38 }
  0xfa   : > { %490 = vmatmul.msk.bf16.vlgmr.msra.gmra.mxu1 %vm305_vm8, %v303_v39 }
 0x173   : > { %v318_v41 = vpop.f32.mrf.mxu0 }
 0x174   : > { %v319_v42 = vadd.f32 %v318_v41, %v297_v40 }
 0x177   : > { %v331_v43 = vpop.f32.mrf.mxu1 }
 0x178   : > { %v332_v44 = vadd.f32 %v331_v43, %v319_v42 }
 0x17a   : > { %v335_v45 = vsub.f32 0.0, %v332_v44 }
 0x17b   : > { %v320_v46 = vpop.f32.mrf.mxu0 }
 0x17c   : > { %v336_v47 = vmul.f32 1.442695, %v335_v45 }
 0x17e   : > { %614 = vpow2.f32 %v336_v47 }
 0x17f   : > { %v333_v48 = vpop.f32.mrf.mxu1 }
 0x184   : > { %v615_v49 = vpop.eup %614 }
 0x185   : > { %v338_v50 = vadd.f32 1.0, %v615_v49 }
 0x187   : > { %616 = vrcp.f32 %v338_v50 }
 0x18d   : > { %v617_v51 = vpop.eup %616 }
 0x18e   : > { %v340_v52 = vmul.f32 %v617_v51, %v332_v44 }
 0x190   : > { %341 = vst [vmem:[%s147_s15] sm:$0xff] %v340_v52 }
 0x191   : > { %701 = shalt.err (!%p698_p4)
}
 0x192   : > { %510 = dma.vmem_to_hbm [thread:$0]  (%p889_p6), %s360_s10, 128, %s362_s20, %s343_s27  }
 0x193 PF: > { %s1095_s23 = sld [smem:[#allocation10_spill]]  ;;  %p518_p5 = scmp.ge.s32.totalorder %s786_s21, 2 }
 0x194   : > { %s1096_s15 = sld [smem:[#allocation17_spill]] }
 0x199   : > { %s373_s8 = sand.u32 1, %s1095_s23  }
 0x19a   : > { %p1097_p7 = scmp.ne.s32.totalorder %s1096_s15, 0  ;;  %s374_s19 = scalar_lea.sflag [#allocation5], %s373_s8 }
 0x19c   : > { %p513_p9 = pnand %p518_p5, %p1097_p7 }
 0x19e   : > { %p514_p10 = pneg %p513_p9 }
 0x1a0   : > { %745 = dma.done.wait (%p514_p10), %s374_s19, 128  }
 0x1a1   : > { %747 = vsyncadd (%p514_p10), %s374_s19, 4294967168  ;;  %s16_s21 = sadd.s32 1, %s786_s21   ;;  %s1098_s18 = sld [smem:[#allocation11_spill]] }
 0x1a2   : > { %p13_p12 = scmp.ge.s32.totalorder %s16_s21, 10   ;;  %s1099_s14 = sld [smem:[#allocation19_spill]] }
 0x1a3   : > { %s1100_s15 = sld [smem:[#allocation12_spill]]  ;;  %s1106_s12 = smov %s754_s13 }
 0x1a4   : > { %s1101_s16 = sld [smem:[#allocation13_spill]] }
 0x1a5   : > { %s1102_s17 = sld [smem:[#allocation14_spill]] }
 0x1a6   : > { %s1103_s30 = sld [smem:[#allocation15_spill]] }
 0x1a7   : > { %s1104_s19 = sld [smem:[#allocation16_spill]]  ;;  %s1107_s13 = smov %s1098_s18 }
 0x1a8   : > { %s1105_s20 = sld [smem:[#allocation18_spill]]  ;;  %15 = sbr.rel (!%p13_p12) target bundleno = 6 (0x6), region = 75 }
 0x1ac   : > { %s1108_s18 = smov %s1103_s30 }
 0x1ad   :  { %380 = vsyncpa [#allocation5], 1 }
 0x1ae   :  { %382 = vsyncpa [#allocation5 + $0x1], 1 }
 0x1af   :  { %383 = vsyncmov [#allocation3] }
 0x1b2   :  { %s384_s24 = vpop.sfrf %383 }
 0x1b3   :  { %p497_p6 = scmp.ne.s32.totalorder %s384_s24, 0 }
 0x1b5   :  { %388 = shalt.err (%p497_p6)  }
 0x1b6   :  { %390 = vsyncmov [#allocation3 + $0x1] }
 0x1b9   :  { %s391_s29 = vpop.sfrf %390 }
 0x1ba   :  { %p498_p13 = scmp.ne.s32.totalorder %s391_s29, 0 }
 0x1bc   :  { %395 = shalt.err (%p498_p13)  }

</bundles_post_ra>
